<compile_context>
chip_gen: v7x
topology: tpu7x:2x2x1
jax: 0.10.0
libtpu: 0.0.40
codegen_flags: <defaults>
</compile_context>

<pallas_src>
import jax
import jax.numpy as jnp
from jax.experimental import pallas as pl
from jax.experimental.pallas import tpu as pltpu


# ----------------------------------------------------------------------------- #
# Kernel (one batch tile of BB graph states per grid step; M = BB * N rows)
# ----------------------------------------------------------------------------- #
def qnetwork_kernel(a_ref, x_ref, w1_ref, b_ref, w_ref, m_ref, wq_ref, bq_ref,
                    q_ref):
    a = a_ref[...]                                   # [M, M] block-diag A_hat

    # --- GCN layer 1: relu(A @ (x @ W1) + b1) * mask1 --------------------------
    # A @ (x ⊗ w1) == (A @ x) ⊗ w1  -> VPU broadcast-mul + XLU lane reduce,
    # no MXU matmul on the critical path for this layer.
    ax = jnp.sum(a * x_ref[...], axis=-1, keepdims=True)          # [M, 1]
    h = ax * w1_ref[...] + b_ref[0:1, :]                          # [M, Hp]
    h = jnp.maximum(h, 0.0) * m_ref[0]               # masks carry 1/(1-p) = 2

    # --- GCN layer 2: whole-batch aggregation is ONE matmul --------------------
    h = jnp.dot(h, w_ref[0], preferred_element_type=jnp.float32)
    h = jnp.dot(a, h, preferred_element_type=jnp.float32) + b_ref[1:2, :]
    h = jnp.maximum(h, 0.0) * m_ref[1]

    # --- GCN layer 3 ------------------------------------------------------------
    h = jnp.dot(h, w_ref[1], preferred_element_type=jnp.float32)
    h = jnp.dot(a, h, preferred_element_type=jnp.float32) + b_ref[2:3, :]
    h = jnp.maximum(h, 0.0) * m_ref[2]

    # --- all per-node Q heads in one lane-dense MXU matmul ----------------------
    # Wq_cat is block-diagonal: node n's head occupies columns [n*M_PAD, n*M_PAD+m).
    q_ref[...] = (jnp.dot(h, wq_ref[...], preferred_element_type=jnp.float32)
                  + bq_ref[...])


# ----------------------------------------------------------------------------- #
# Wrapper
# ----------------------------------------------------------------------------- #
def qnetwork_forward(a_bd, x_rows, w1p, b_stack, w_stack, m_flat, wq_cat,
                     bq_tiled):
    """Returns the lane-dense q slab [B_pad*N, N*M_PAD]; unpack in the caller."""
    nsteps, _, m_rows = x_rows.shape          # m_rows = BB * N (matmul M dim)
    h_pad = w1p.shape[1]
    q_cols = wq_cat.shape[1]
    total_rows = m_flat.shape[1]              # B_pad * N

    return pl.pallas_call(
        qnetwork_kernel,
        grid=(nsteps,),
        in_specs=[
            pl.BlockSpec((m_rows, m_rows),   lambda b: (0, 0)),     # block-diag A
            pl.BlockSpec((None, 1, m_rows),  lambda b: (b, 0, 0)),  # x (in lanes)
            pl.BlockSpec((1, h_pad),         lambda b: (0, 0)),     # W1 row
            pl.BlockSpec((3, h_pad),         lambda b: (0, 0)),     # b1,b2,b3
            pl.BlockSpec((2, h_pad, h_pad),  lambda b: (0, 0, 0)),  # W2, W3
            pl.BlockSpec((3, m_rows, h_pad), lambda b: (0, b, 0)),  # dropout masks
            pl.BlockSpec((h_pad, q_cols),    lambda b: (0, 0)),     # Wq block-diag
            pl.BlockSpec((m_rows, q_cols),   lambda b: (0, 0)),     # bq tiled
        ],
        out_specs=pl.BlockSpec((m_rows, q_cols), lambda b: (b, 0)),
        out_shape=jax.ShapeDtypeStruct((total_rows, q_cols), jnp.float32),
        compiler_params=pltpu.CompilerParams(
            dimension_semantics=("parallel",)),   # batch-tile axis -> 2 TCs on v7x
    )(a_bd, x_rows, w1p, b_stack, w_stack, m_flat, wq_cat, bq_tiled)


# ----------------------------------------------------------------------------- #
# Host-side glue (not the hot path)
# ----------------------------------------------------------------------------- #
def build_gcn_adj(edge_index, num_nodes):
    """Dense D^-1/2 (A + I) D^-1/2 from a [2, E] edge_index."""
    src, dst = edge_index[0], edge_index[1]
    a = jnp.zeros((num_nodes, num_nodes), jnp.float32)
    a = a.at[dst, src].set(1.0)                                   # src -> dst
    a = jnp.maximum(a, jnp.eye(num_nodes, dtype=jnp.float32))     # self-loops
    deg = jnp.sum(a, axis=1)
    dinv = jnp.where(deg > 0, 1.0 / jnp.sqrt(deg), 0.0)
    return dinv[:, None] * a * dinv[None, :]


def init_params(key, hidden_dim, num_nodes_phases):
    """Logical (unpadded) parameters of the PyTorch module."""
    n_nodes = len(num_nodes_phases)
    m_max = max(num_nodes_phases)
    ks = jax.random.split(key, 8)
    w1 = jax.random.normal(ks[0], (1, hidden_dim), jnp.float32) * 0.5
    b1 = jax.random.normal(ks[1], (1, hidden_dim), jnp.float32) * 0.1
    w2 = jax.random.normal(ks[2], (hidden_dim, hidden_dim), jnp.float32) * (1.0 / jnp.sqrt(hidden_dim))
    b2 = jax.random.normal(ks[3], (1, hidden_dim), jnp.float32) * 0.1
    w3 = jax.random.normal(ks[4], (hidden_dim, hidden_dim), jnp.float32) * (1.0 / jnp.sqrt(hidden_dim))
    b3 = jax.random.normal(ks[5], (1, hidden_dim), jnp.float32) * 0.1
    wq = jax.random.normal(ks[6], (n_nodes, hidden_dim, m_max), jnp.float32) * (1.0 / jnp.sqrt(hidden_dim))
    bq = jax.random.normal(ks[7], (n_nodes, m_max), jnp.float32) * 0.1
    # zero out the padding columns of each per-node head
    col = jnp.arange(m_max)[None, :]
    valid = (col < jnp.asarray(num_nodes_phases)[:, None]).astype(jnp.float32)
    wq = wq * valid[:, None, :]
    bq = bq * valid
    return (w1, b1, w2, b2, w3, b3, wq, bq)


def pack_params_for_kernel(params, hidden_dim, h_pad, n_nodes, m_max, m_pad):
    """Pad hidden dim to h_pad and pack small params into few lane-dense arrays."""
    w1, b1, w2, b2, w3, b3, wq, bq = params
    pad_h = h_pad - hidden_dim

    w1p = jnp.pad(w1, ((0, 0), (0, pad_h)))                                # [1, Hp]
    b_stack = jnp.pad(jnp.concatenate([b1, b2, b3], axis=0),               # [3, Hp]
                      ((0, 0), (0, pad_h)))
    w_stack = jnp.pad(jnp.stack([w2, w3], axis=0),                         # [2, Hp, Hp]
                      ((0, 0), (0, pad_h), (0, pad_h)))

    # Block-diagonal concatenation of the per-node heads (lane-dense: n_nodes*m_pad).
    # NOTE: correctness relies on rows [hidden_dim:h_pad] staying zero (padded h
    # columns are kept exactly zero by zero-padded W/b/masks).
    wq_cat = jnp.zeros((h_pad, n_nodes * m_pad), jnp.float32)
    bq_cat = jnp.zeros((n_nodes, n_nodes * m_pad), jnp.float32)
    for n in range(n_nodes):
        wq_cat = wq_cat.at[:hidden_dim, n * m_pad:n * m_pad + m_max].set(wq[n])
        bq_cat = bq_cat.at[n, n * m_pad:n * m_pad + m_max].set(bq[n])
    return w1p, b_stack, w_stack, wq_cat, bq_cat


def pack_batch_for_kernel(a_hat, x, masks, batch_tile, h_pad):
    """Flatten (batch, node) into MXU rows; pad batch to a multiple of batch_tile."""
    batch, n_nodes, _ = x.shape
    hidden = masks[0].shape[-1]
    bb = batch_tile
    b_pad = ((batch + bb - 1) // bb) * bb
    pad_b = b_pad - batch
    nsteps = b_pad // bb
    m_rows = bb * n_nodes

    # Block-diagonal A so one matmul aggregates the whole batch tile per layer.
    a_bd = jnp.kron(jnp.eye(bb, dtype=jnp.float32), a_hat)        # [M, M]
    # x lives in the lane dim so layer-1's A@x is a VPU mul + lane reduce.
    x_rows = jnp.pad(x, ((0, pad_b), (0, 0), (0, 0))).reshape(nsteps, 1, m_rows)
    m = jnp.stack(masks, axis=0)                                   # [3, B, N, H]
    m_flat = jnp.pad(m, ((0, 0), (0, pad_b), (0, 0), (0, h_pad - hidden))
                     ).reshape(3, b_pad * n_nodes, h_pad)
    return a_bd, x_rows, m_flat, b_pad, nsteps


def reference_forward(a_hat, x, params, masks):
    """Pure-JAX reference (per batch element), f32-accurate matmuls."""
    w1, b1, w2, b2, w3, b3, wq, bq = params
    m1, m2, m3 = masks
    hp = "highest"

    def single(xb, m1b, m2b, m3b):
        h = jnp.dot(a_hat, jnp.dot(xb, w1, precision=hp), precision=hp) + b1
        h = jnp.maximum(h, 0.0) * m1b
        h = jnp.dot(a_hat, jnp.dot(h, w2, precision=hp), precision=hp) + b2
        h = jnp.maximum(h, 0.0) * m2b
        h = jnp.dot(a_hat, jnp.dot(h, w3, precision=hp), precision=hp) + b3
        h = jnp.maximum(h, 0.0) * m3b
        return jnp.einsum("nh,nhm->nm", h, wq, precision=hp) + bq

    return jax.vmap(single)(x, m1, m2, m3)


# ----------------------------------------------------------------------------- #
# Demo
# ----------------------------------------------------------------------------- #
if __name__ == "__main__":
    key = jax.random.PRNGKey(0)

    num_nodes_phases = [4, 3, 5, 2, 4, 3, 5, 2]      # one Q-head per node
    n_nodes = len(num_nodes_phases)
    hidden_dim = 32
    batch = 32                                       # batch of graph states

    H_PAD = 128                                      # lane-dense hidden width
    m_max = max(num_nodes_phases)
    assert 128 % n_nodes == 0
    M_PAD = 128 // n_nodes                           # 16 -> q slab is 128 lanes wide
    assert M_PAD >= m_max
    # BB*N = 128 rows per MXU pass (fills the 128-row MXU; 256//n_nodes on v6e/v7x
    # would fill the 256-row MXU — per-step VMEM stays <1 MiB either way).
    BATCH_TILE = 128 // n_nodes

    k_x, k_p, k_m1, k_m2, k_m3 = jax.random.split(key, 5)

    # node features [B, N, 1] and a ring graph edge_index [2, 2N]
    x = jax.random.normal(k_x, (batch, n_nodes, 1), jnp.float32)
    idx = jnp.arange(n_nodes)
    src = jnp.concatenate([idx, (idx + 1) % n_nodes])
    dst = jnp.concatenate([(idx + 1) % n_nodes, idx])
    edge_index = jnp.stack([src, dst])

    a_hat = build_gcn_adj(edge_index, n_nodes)
    params = init_params(k_p, hidden_dim, num_nodes_phases)

    # inverted-dropout masks with the 1/(1-p)=2 scale folded in ({0, 2})
    masks = tuple(
        jax.random.bernoulli(k, 0.5, (batch, n_nodes, hidden_dim)).astype(jnp.float32) * 2.0
        for k in (k_m1, k_m2, k_m3)
    )

    # pack / pad everything for the kernel
    w1p, b_stack, w_stack, wq_cat, bq_cat = pack_params_for_kernel(
        params, hidden_dim, H_PAD, n_nodes, m_max, M_PAD)
    a_bd, x_rows, m_flat, b_pad, nsteps = pack_batch_for_kernel(
        a_hat, x, masks, BATCH_TILE, H_PAD)
    bq_tiled = jnp.tile(bq_cat, (BATCH_TILE, 1))                   # [BB*N, N*M_PAD]

    q_flat = qnetwork_forward(a_bd, x_rows, w1p, b_stack, w_stack, m_flat,
                              wq_cat, bq_tiled)
    jax.block_until_ready(q_flat)

    # extract node n's own head from the block-diagonal slab: [B, N, m_max]
    # (off-diagonal 16-column blocks are meaningless cross-head products by design)
    q = q_flat.reshape(b_pad, n_nodes, n_nodes, M_PAD)[:batch, idx, idx, :m_max]

    # correctness vs. pure-JAX reference
    q_ref = reference_forward(a_hat, x, params, masks)
    assert q.shape == (batch, n_nodes, m_max)
    assert bool(jnp.all(jnp.isfinite(q)))
    assert bool(jnp.allclose(q, q_ref, rtol=1e-2, atol=1e-2)), float(
        jnp.max(jnp.abs(q - q_ref)))

    # unpad: per-state list of per-node q-value vectors (shapes = num_nodes_phases)
    q_values = [[q[b, i, :n] for i, n in enumerate(num_nodes_phases)]
                for b in range(batch)]
    assert all(qv.shape == (n,) for qv, n in zip(q_values[0], num_nodes_phases))

    print("KERNEL_OK")
</pallas_src>

<mosaic_0001>
module attributes {stable_mosaic.version = 11 : i64} {
  func.func @qnetwork_kernel(%arg0: i32, %arg1: memref<128x128xf32, #tpu.memory_space<vmem>>, %arg2: memref<1x1x128xf32, #tpu.memory_space<vmem>>, %arg3: memref<1x128xf32, #tpu.memory_space<vmem>>, %arg4: memref<3x128xf32, #tpu.memory_space<vmem>>, %arg5: memref<2x128x128xf32, #tpu.memory_space<vmem>>, %arg6: memref<3x128x128xf32, #tpu.memory_space<vmem>>, %arg7: memref<128x128xf32, #tpu.memory_space<vmem>>, %arg8: memref<128x128xf32, #tpu.memory_space<vmem>>, %arg9: memref<128x128xf32, #tpu.memory_space<vmem>>) attributes {dimension_semantics = [#tpu.dimension_semantics<parallel>], iteration_bounds = array<i64: 2>, scalar_prefetch = 0 : i64, scratch_operands = 0 : i64, tpu.core_type = #tpu.core_type<tc>, window_params = [{pipeline_mode = #tpu.pipeline_mode<synchronous>, transform_indices = @transform_0, window_bounds = array<i64: 128, 128>}, {transform_indices = @transform_1, window_bounds = array<i64: 1, 1, 128>}, {pipeline_mode = #tpu.pipeline_mode<synchronous>, transform_indices = @transform_2, window_bounds = array<i64: 1, 128>}, {pipeline_mode = #tpu.pipeline_mode<synchronous>, transform_indices = @transform_3, window_bounds = array<i64: 3, 128>}, {pipeline_mode = #tpu.pipeline_mode<synchronous>, transform_indices = @transform_4, window_bounds = array<i64: 2, 128, 128>}, {transform_indices = @transform_5, window_bounds = array<i64: 3, 128, 128>}, {pipeline_mode = #tpu.pipeline_mode<synchronous>, transform_indices = @transform_6, window_bounds = array<i64: 128, 128>}, {pipeline_mode = #tpu.pipeline_mode<synchronous>, transform_indices = @transform_7, window_bounds = array<i64: 128, 128>}, {transform_indices = @transform_8, window_bounds = array<i64: 128, 128>}]} {
    %c0 = arith.constant 0 : index
    %c0_0 = arith.constant 0 : index
    %0 = vector.load %arg1[%c0, %c0_0] : memref<128x128xf32, #tpu.memory_space<vmem>>, vector<128x128xf32>
    %c0_1 = arith.constant 0 : index
    %c0_2 = arith.constant 0 : index
    %c0_3 = arith.constant 0 : index
    %1 = vector.load %arg2[%c0_1, %c0_2, %c0_3] : memref<1x1x128xf32, #tpu.memory_space<vmem>>, vector<1x1x128xf32>
    %2 = vector.shape_cast %1 : vector<1x1x128xf32> to vector<1x128xf32>
    %3 = vector.broadcast %2 : vector<1x128xf32> to vector<128x128xf32>
    %4 = arith.mulf %0, %3 : vector<128x128xf32>
    %cst = arith.constant dense<0.000000e+00> : vector<128xf32>
    %5 = vector.multi_reduction <add>, %4, %cst [1] : vector<128x128xf32> to vector<128xf32>
    %6 = vector.shape_cast %5 : vector<128xf32> to vector<128x1xf32>
    %c0_4 = arith.constant 0 : index
    %c0_5 = arith.constant 0 : index
    %7 = vector.load %arg3[%c0_4, %c0_5] : memref<1x128xf32, #tpu.memory_space<vmem>>, vector<1x128xf32>
    %8 = vector.broadcast %6 : vector<128x1xf32> to vector<128x128xf32>
    %9 = vector.broadcast %7 : vector<1x128xf32> to vector<128x128xf32>
    %10 = arith.mulf %8, %9 : vector<128x128xf32>
    %c0_6 = arith.constant 0 : index
    %c0_7 = arith.constant 0 : index
    %11 = vector.load %arg4[%c0_6, %c0_7] : memref<3x128xf32, #tpu.memory_space<vmem>>, vector<1x128xf32>
    %12 = vector.broadcast %11 : vector<1x128xf32> to vector<128x128xf32>
    %13 = arith.addf %10, %12 : vector<128x128xf32>
    %cst_8 = arith.constant 0.000000e+00 : f32
    %14 = vector.broadcast %cst_8 : f32 to vector<128x128xf32>
    %15 = arith.maximumf %13, %14 : vector<128x128xf32>
    %c0_9 = arith.constant 0 : index
    %c0_10 = arith.constant 0 : index
    %c0_11 = arith.constant 0 : index
    %16 = vector.load %arg6[%c0_9, %c0_10, %c0_11] : memref<3x128x128xf32, #tpu.memory_space<vmem>>, vector<1x128x128xf32>
    %17 = vector.shape_cast %16 : vector<1x128x128xf32> to vector<128x128xf32>
    %18 = arith.mulf %15, %17 : vector<128x128xf32>
    %c0_12 = arith.constant 0 : index
    %c0_13 = arith.constant 0 : index
    %c0_14 = arith.constant 0 : index
    %19 = vector.load %arg5[%c0_12, %c0_13, %c0_14] : memref<2x128x128xf32, #tpu.memory_space<vmem>>, vector<1x128x128xf32>
    %20 = vector.shape_cast %19 : vector<1x128x128xf32> to vector<128x128xf32>
    %cst_15 = arith.constant dense<0.000000e+00> : vector<128x128xf32>
    %21 = tpu.matmul %18, %20, %cst_15 {dimension_numbers = #tpu.dot_dimension_numbers<[1], [0], [0], [1], [0, 0, 1, 1], [], []>} : vector<128x128xf32>, vector<128x128xf32>, vector<128x128xf32> -> vector<128x128xf32>
    %cst_16 = arith.constant dense<0.000000e+00> : vector<128x128xf32>
    %22 = tpu.matmul %0, %21, %cst_16 {dimension_numbers = #tpu.dot_dimension_numbers<[1], [0], [0], [1], [0, 0, 1, 1], [], []>} : vector<128x128xf32>, vector<128x128xf32>, vector<128x128xf32> -> vector<128x128xf32>
    %c1 = arith.constant 1 : index
    %c0_17 = arith.constant 0 : index
    %23 = vector.load %arg4[%c1, %c0_17] : memref<3x128xf32, #tpu.memory_space<vmem>>, vector<1x128xf32>
    %24 = vector.broadcast %23 : vector<1x128xf32> to vector<128x128xf32>
    %25 = arith.addf %22, %24 : vector<128x128xf32>
    %cst_18 = arith.constant 0.000000e+00 : f32
    %26 = vector.broadcast %cst_18 : f32 to vector<128x128xf32>
    %27 = arith.maximumf %25, %26 : vector<128x128xf32>
    %c1_19 = arith.constant 1 : index
    %c0_20 = arith.constant 0 : index
    %c0_21 = arith.constant 0 : index
    %28 = vector.load %arg6[%c1_19, %c0_20, %c0_21] : memref<3x128x128xf32, #tpu.memory_space<vmem>>, vector<1x128x128xf32>
    %29 = vector.shape_cast %28 : vector<1x128x128xf32> to vector<128x128xf32>
    %30 = arith.mulf %27, %29 : vector<128x128xf32>
    %c1_22 = arith.constant 1 : index
    %c0_23 = arith.constant 0 : index
    %c0_24 = arith.constant 0 : index
    %31 = vector.load %arg5[%c1_22, %c0_23, %c0_24] : memref<2x128x128xf32, #tpu.memory_space<vmem>>, vector<1x128x128xf32>
    %32 = vector.shape_cast %31 : vector<1x128x128xf32> to vector<128x128xf32>
    %cst_25 = arith.constant dense<0.000000e+00> : vector<128x128xf32>
    %33 = tpu.matmul %30, %32, %cst_25 {dimension_numbers = #tpu.dot_dimension_numbers<[1], [0], [0], [1], [0, 0, 1, 1], [], []>} : vector<128x128xf32>, vector<128x128xf32>, vector<128x128xf32> -> vector<128x128xf32>
    %cst_26 = arith.constant dense<0.000000e+00> : vector<128x128xf32>
    %34 = tpu.matmul %0, %33, %cst_26 {dimension_numbers = #tpu.dot_dimension_numbers<[1], [0], [0], [1], [0, 0, 1, 1], [], []>} : vector<128x128xf32>, vector<128x128xf32>, vector<128x128xf32> -> vector<128x128xf32>
    %c2 = arith.constant 2 : index
    %c0_27 = arith.constant 0 : index
    %35 = vector.load %arg4[%c2, %c0_27] : memref<3x128xf32, #tpu.memory_space<vmem>>, vector<1x128xf32>
    %36 = vector.broadcast %35 : vector<1x128xf32> to vector<128x128xf32>
    %37 = arith.addf %34, %36 : vector<128x128xf32>
    %cst_28 = arith.constant 0.000000e+00 : f32
    %38 = vector.broadcast %cst_28 : f32 to vector<128x128xf32>
    %39 = arith.maximumf %37, %38 : vector<128x128xf32>
    %c2_29 = arith.constant 2 : index
    %c0_30 = arith.constant 0 : index
    %c0_31 = arith.constant 0 : index
    %40 = vector.load %arg6[%c2_29, %c0_30, %c0_31] : memref<3x128x128xf32, #tpu.memory_space<vmem>>, vector<1x128x128xf32>
    %41 = vector.shape_cast %40 : vector<1x128x128xf32> to vector<128x128xf32>
    %42 = arith.mulf %39, %41 : vector<128x128xf32>
    %c0_32 = arith.constant 0 : index
    %c0_33 = arith.constant 0 : index
    %43 = vector.load %arg7[%c0_32, %c0_33] : memref<128x128xf32, #tpu.memory_space<vmem>>, vector<128x128xf32>
    %cst_34 = arith.constant dense<0.000000e+00> : vector<128x128xf32>
    %44 = tpu.matmul %42, %43, %cst_34 {dimension_numbers = #tpu.dot_dimension_numbers<[1], [0], [0], [1], [0, 0, 1, 1], [], []>} : vector<128x128xf32>, vector<128x128xf32>, vector<128x128xf32> -> vector<128x128xf32>
    %c0_35 = arith.constant 0 : index
    %c0_36 = arith.constant 0 : index
    %45 = vector.load %arg8[%c0_35, %c0_36] : memref<128x128xf32, #tpu.memory_space<vmem>>, vector<128x128xf32>
    %46 = arith.addf %44, %45 : vector<128x128xf32>
    %c0_37 = arith.constant 0 : index
    %c0_38 = arith.constant 0 : index
    %47 = vector.load %arg9[%c0_37, %c0_38] : memref<128x128xf32, #tpu.memory_space<vmem>>, vector<128x128xf32>
    tpu.vector_store %arg9[%c0_37, %c0_38], %46 {strides = array<i32>} : memref<128x128xf32, #tpu.memory_space<vmem>>, vector<128x128xf32>,
    return
  }
  func.func @transform_0(%arg0: i32) -> (i32, i32) {
    %c0_i32 = arith.constant 0 : i32
    %c0_i32_0 = arith.constant 0 : i32
    %c0_i32_1 = arith.constant 0 : i32
    return %c0_i32, %c0_i32_0 : i32, i32
  }
  func.func @transform_1(%arg0: i32) -> (i32, i32, i32) {
    %c0_i32 = arith.constant 0 : i32
    %c0_i32_0 = arith.constant 0 : i32
    %c0_i32_1 = arith.constant 0 : i32
    return %arg0, %c0_i32, %c0_i32_0 : i32, i32, i32
  }
  func.func @transform_2(%arg0: i32) -> (i32, i32) {
    %c0_i32 = arith.constant 0 : i32
    %c0_i32_0 = arith.constant 0 : i32
    %c0_i32_1 = arith.constant 0 : i32
    return %c0_i32, %c0_i32_0 : i32, i32
  }
  func.func @transform_3(%arg0: i32) -> (i32, i32) {
    %c0_i32 = arith.constant 0 : i32
    %c0_i32_0 = arith.constant 0 : i32
    %c0_i32_1 = arith.constant 0 : i32
    return %c0_i32, %c0_i32_0 : i32, i32
  }
  func.func @transform_4(%arg0: i32) -> (i32, i32, i32) {
    %c0_i32 = arith.constant 0 : i32
    %c0_i32_0 = arith.constant 0 : i32
    %c0_i32_1 = arith.constant 0 : i32
    %c0_i32_2 = arith.constant 0 : i32
    return %c0_i32, %c0_i32_0, %c0_i32_1 : i32, i32, i32
  }
  func.func @transform_5(%arg0: i32) -> (i32, i32, i32) {
    %c0_i32 = arith.constant 0 : i32
    %c0_i32_0 = arith.constant 0 : i32
    %c0_i32_1 = arith.constant 0 : i32
    return %c0_i32, %arg0, %c0_i32_0 : i32, i32, i32
  }
  func.func @transform_6(%arg0: i32) -> (i32, i32) {
    %c0_i32 = arith.constant 0 : i32
    %c0_i32_0 = arith.constant 0 : i32
    %c0_i32_1 = arith.constant 0 : i32
    return %c0_i32, %c0_i32_0 : i32, i32
  }
  func.func @transform_7(%arg0: i32) -> (i32, i32) {
    %c0_i32 = arith.constant 0 : i32
    %c0_i32_0 = arith.constant 0 : i32
    %c0_i32_1 = arith.constant 0 : i32
    return %c0_i32, %c0_i32_0 : i32, i32
  }
  func.func @transform_8(%arg0: i32) -> (i32, i32) {
    %c0_i32 = arith.constant 0 : i32
    %c0_i32_0 = arith.constant 0 : i32
    return %arg0, %c0_i32 : i32, i32
  }
}

</mosaic_0001>

<bundles_post_ra>
// kernel: tpu_custom_call.1
= control target key start
LH: loop header
LB: loop body
LE: loop exit
PB: predicated region body
PF: predicated region fallthrough
CT: control target
= control target key end

     0   :  { %s3230_s0 = inlined_call_operand.hbm [shape: f32[128,128], index: 0, kind: input, shape index: {}]   ;;  %s3231_s1 = inlined_call_operand.vmem [shape: f32[2,1,128], index: 1, kind: input, shape index: {}]   ;;  %s3232_s2 = inlined_call_operand.vmem [shape: f32[1,128], index: 2, kind: input, shape index: {}]   ;;  %s3233_s3 = inlined_call_operand.vmem [shape: f32[3,128], index: 3, kind: input, shape index: {}]   ;;  %s3234_s4 = inlined_call_operand.hbm [shape: f32[2,128,128], index: 4, kind: input, shape index: {}]   ;;  %s3235_s5 = inlined_call_operand.hbm [shape: f32[3,256,128], index: 5, kind: input, shape index: {}]   ;;  %s3236_s6 = inlined_call_operand.hbm [shape: f32[128,128], index: 6, kind: input, shape index: {}]   ;;  %s3237_s7 = inlined_call_operand.hbm [shape: f32[128,128], index: 7, kind: input, shape index: {}]   ;;  %s3238_s8 = inlined_call_operand.hbm [shape: f32[256,128], index: 8, kind: output, shape index: {}]  }
   0x1   :  { %3251 = sst [smem:[#allocation26_spill]] %s3234_s4 }
   0x2   :  { %3252 = sst [smem:[#allocation27_spill]] %s3238_s8 }
   0x3   :  { %13 = vsyncpa [#allocation3], 0 }
   0x4   :  { %14 = vsyncpa [#allocation6], 0 }
   0x5   :  { %15 = vsyncpa [#allocation10], 0 }
   0x6   :  { %16 = vsyncpa [#allocation4], 0 }
   0x7   :  { %18 = vsyncpa [#allocation4 + $0x1], 0  ;;  %s2666_s27 = smov 0   ;;  %s2668_s28 = smov 0  }
   0x8   :  { %s2670_s29 = smov 0   ;;  %s2672_s30 = smov 0  }
   0x9 LB: > { %3253 = sst [smem:[#allocation21_spill]] %s2592_s27  ;;  %s2687_s9 = sadd.s32 4294967295, %s2604_s30   ;;  %s2604_s30 = sphi %s2672_s30, %s3283_s30   ;;  %s2600_s29 = sphi %s2670_s29, %s3287_s29   ;;  %s2596_s28 = sphi %s2668_s28, %s3286_s28   ;;  %s2592_s27 = sphi %s2666_s27, %s3285_s27  }
   0xa   : > { %s1632_s10 = sadd.s32 4294967294, %s2604_s30   ;;  %s2691_s11 = sadd.s32 1, %s2604_s30  }
   0xb   : > { %3254 = sst [smem:[#allocation22_spill]] %s2691_s11  ;;  %s141_s12 = sadd.s32 1, %s2600_s29 }
   0xc   : > { %s138_s13 = ssub.s32 %s2604_s30, %s2691_s11  ;;  %p148_p0 = scmp.ne.s32.totalorder %s2600_s29, %s2596_s28 }
   0xd   : > { %p139_p1 = scmp.eq.s32.totalorder %s138_s13, 0  ;;  %p149_p2 = scmp.eq.s32.totalorder %s2604_s30, 0 }
   0xe   : > { %p154_p3 = scmp.ne.s32.totalorder %s2596_s28, %s2592_s27  ;;  %p3239_p4 = scmp.eq.s32.totalorder %s2687_s9, 0 }
   0xf   : > { %s2703_s14 = scalar_select %p139_p1, %s2600_s29, %s141_s12  }
  0x10   : > { %p2705_p5 = por %p149_p2, %p148_p0  ;;  %p2711_p6 = por %p3239_p4, %p154_p3 }
  0x11   : > { %3255 = sst [smem:[#allocation23_spill]] %s2703_s14  ;;  %p220_p7 = scmp.eq.s32.totalorder %s2687_s9, 1 }
  0x12   : > { %s3256_s15 = scalar_select %p2705_p5, 1, 0 }
  0x13   : > { %s3257_s16 = scalar_select %p2711_p6, 1, 0 }
  0x14   : > { %p226_p8 = scmp.eq.s32.totalorder %s1632_s10, 1  ;;  %p1633_p9 = scmp.ge.s32.totalorder %s2604_s30, 1 }
  0x15   : > { %p233_p10 = scmp.lt.s32.totalorder %s2604_s30, 3  ;;  %p2718_p11 = por %p220_p7, %p148_p0 }
  0x16   : > { %p2722_p12 = por %p226_p8, %p154_p3  ;;  %s2606_s20 = smov [#allocation5]  }
  0x17   : > { %s3258_s17 = scalar_select %p2718_p11, 1, 0 }
  0x18   : > { %s3260_s18 = scalar_select %p2722_p12, 1, 0 }
  0x19   : > { %3259 = sst [smem:[#allocation24_spill]] %s3258_s17  ;;  %p2726_p13 = pnand %p1633_p9, %p233_p10 }
  0x1a   : > { %3261 = sst [smem:[#allocation25_spill]] %s3260_s18  ;;  %s264_s21 = sshll.u32 %s2606_s20, 4  ;;  %s265_s21 = int_to_ptr.vmem [resolvable:$true] %s264_s21 }
  0x1b   : > { %s3262_s19 = scalar_select %p2726_p13, 1, 0 }
  0x1c   : > { %p2338_p1 = pneg %p2726_p13  ;;  %s2607_s23 = smov [#allocation2]  }
  0x1d   : > { %s245_s24 = sshll.u32 %s2607_s23, 4  ;;  %s3264_s4 = sld [smem:[#allocation26_spill]]  ;;  %s2738_s24 = int_to_ptr.vmem [resolvable:$true] %s245_s24 }
  0x1e   : > { %p2734_p2 = pnand %p2338_p1, %p3239_p4 }
  0x20   : > { %p2748_p3 = pneg %p2734_p2 }
  0x23   : > { %s2410_s10 = scalar_lea.hbm %s3264_s4, 4096 }
  0x24   : > { %p2411_p0 = scmp.ne.s32.totalorder %s3264_s4, %s2410_s10  ;;  %p2417_p9 = scmp.lt.u32.totalorder %s2410_s10, %s3264_s4 }
  0x26   : > { %p2413_p7 = pnand %p2748_p3, %p2411_p0 }
  0x28   : > { %p2414_p8 = pneg %p2413_p7 }
  0x2a   : > { %p2419_p10 = pnand %p2417_p9, %p2414_p8 }
  0x2c   : > { %2422 = shalt.err (!%p2419_p10)
}
  0x2d   : > { %s2423_s25 = scalar_lea.vmem %s265_s21, 4096  ;;  %p2431_p11 = scmp.lt.s32.totalorder %s265_s21, %s265_s21 }
  0x2e   : > { %p2424_p1 = scmp.ne.s32.totalorder %s265_s21, %s2423_s25  ;;  %p2432_p6 = scmp.lt.s32.totalorder %s2423_s25, %s2423_s25 }
  0x30   : > { %p2426_p4 = pnand %p2424_p1, %p2748_p3  ;;  %p2433_p13 = por %p2432_p6, %p2431_p11 }
  0x32   : > { %p2427_p12 = pneg %p2426_p4 }
  0x34   : > { %p2434_p5 = pnand %p2433_p13, %p2427_p12 }
  0x36   : > { %2437 = shalt.err (!%p2434_p5)
}
  0x37   : > { %s2608_s26 = smov 128   ;;  %s2609_s12 = smov 8  }
  0x38   : > { %2344 = dma.hbm_to_vmem [thread:$0]  (!%p2734_p2), %s3264_s4, 4096, %s265_s21, [#allocation6], %s2608_s26, %s2608_s26, %s2609_s12  }
  0x39   : > { %s2438_s11 = scalar_lea.hbm %s3230_s0, 2048 }
  0x3a   : > { %p2439_p4 = scmp.ne.s32.totalorder %s3230_s0, %s2438_s11  ;;  %p2445_p11 = scmp.lt.u32.totalorder %s2438_s11, %s3230_s0 }
  0x3c   : > { %p2441_p5 = pnand %p2439_p4, %p2748_p3 }
  0x3e   : > { %p2442_p6 = pneg %p2441_p5 }
  0x40   : > { %p2447_p12 = pnand %p2445_p11, %p2442_p6 }
  0x42   : > { %2450 = shalt.err (!%p2447_p12)
}
  0x43   : > { %s2451_s21 = scalar_lea.vmem %s2738_s24, 2048  ;;  %p2459_p8 = scmp.lt.s32.totalorder %s2738_s24, %s2738_s24 }
  0x44   : > { %p2452_p13 = scmp.ne.s32.totalorder %s2738_s24, %s2451_s21  ;;  %p2460_p9 = scmp.lt.s32.totalorder %s2451_s21, %s2451_s21 }
  0x46   : > { %p2454_p0 = pnand %p2452_p13, %p2748_p3  ;;  %p2461_p10 = por %p2460_p9, %p2459_p8 }
  0x48   : > { %p2455_p7 = pneg %p2454_p0 }
  0x4a   : > { %p2462_p1 = pnand %p2461_p10, %p2455_p7 }
  0x4c   : > { %2465 = shalt.err (!%p2462_p1)
}
  0x4d   : > { %2341 = dma.hbm_to_vmem [thread:$0]  (!%p2734_p2), %s3230_s0, 2048, %s2738_s24, [#allocation3], %s2608_s26, %s2608_s26, %s2609_s12  }
  0x4e   : > { %s2610_s11 = smov [#allocation8]   ;;  %s2611_s14 = smov [#allocation9]  }
  0x4f   : > { %s277_s18 = sshll.u32 %s2610_s11, 4  ;;  %s290_s10 = sshll.u32 %s2611_s14, 4  ;;  %s278_s18 = int_to_ptr.vmem [resolvable:$true] %s277_s18  ;;  %s291_s10 = int_to_ptr.vmem [resolvable:$true] %s290_s10 }
  0x50   : > { %s2466_s25 = scalar_lea.hbm %s3236_s6, 2048 }
  0x51   : > { %p2467_p4 = scmp.ne.s32.totalorder %s3236_s6, %s2466_s25  ;;  %p2473_p11 = scmp.lt.u32.totalorder %s2466_s25, %s3236_s6 }
  0x53   : > { %p2469_p5 = pnand %p2467_p4, %p2748_p3 }
  0x55   : > { %p2470_p6 = pneg %p2469_p5 }
  0x57   : > { %p2475_p12 = pnand %p2473_p11, %p2470_p6 }
  0x59   : > { %2478 = shalt.err (!%p2475_p12)
}
  0x5a   : > { %s2479_s24 = scalar_lea.vmem %s278_s18, 2048  ;;  %p2487_p8 = scmp.lt.s32.totalorder %s278_s18, %s278_s18 }
  0x5b   : > { %p2480_p13 = scmp.ne.s32.totalorder %s278_s18, %s2479_s24  ;;  %p2488_p9 = scmp.lt.s32.totalorder %s2479_s24, %s2479_s24 }
  0x5d   : > { %p2482_p0 = pnand %p2480_p13, %p2748_p3  ;;  %p2489_p10 = por %p2488_p9, %p2487_p8 }
  0x5f   : > { %p2483_p7 = pneg %p2482_p0 }
  0x61   : > { %p2490_p1 = pnand %p2489_p10, %p2483_p7 }
  0x63   : > { %2493 = shalt.err (!%p2490_p1)
}
  0x64   : > { %2347 = dma.hbm_to_vmem [thread:$0]  (!%p2734_p2), %s3236_s6, 2048, %s278_s18, [#allocation6], %s2608_s26, %s2608_s26, %s2609_s12  }
  0x65   : > { %s2494_s14 = scalar_lea.hbm %s3237_s7, 2048 }
  0x66   : > { %p2495_p4 = scmp.ne.s32.totalorder %s3237_s7, %s2494_s14  ;;  %p2501_p11 = scmp.lt.u32.totalorder %s2494_s14, %s3237_s7 }
  0x68   : > { %p2497_p5 = pnand %p2495_p4, %p2748_p3 }
  0x6a   : > { %p2498_p6 = pneg %p2497_p5 }
  0x6c   : > { %p2503_p12 = pnand %p2501_p11, %p2498_p6 }
  0x6e   : > { %2506 = shalt.err (!%p2503_p12)
}
  0x6f   : > { %s2507_s8 = scalar_lea.vmem %s291_s10, 2048  ;;  %p2515_p8 = scmp.lt.s32.totalorder %s291_s10, %s291_s10 }
  0x70   : > { %p2508_p13 = scmp.ne.s32.totalorder %s291_s10, %s2507_s8  ;;  %p2516_p9 = scmp.lt.s32.totalorder %s2507_s8, %s2507_s8 }
  0x72   : > { %p2510_p0 = pnand %p2508_p13, %p2748_p3  ;;  %p2517_p10 = por %p2516_p9, %p2515_p8 }
  0x74   : > { %p2511_p7 = pneg %p2510_p0 }
  0x76   : > { %p2518_p1 = pnand %p2517_p10, %p2511_p7 }
  0x78   : > { %2521 = shalt.err (!%p2518_p1)
}
  0x79   : > { %2350 = dma.hbm_to_vmem [thread:$0]  (!%p2734_p2), %s3237_s7, 2048, %s291_s10, [#allocation10], %s2608_s26, %s2608_s26, %s2609_s12  }
  0x7a   : > { %p1638_p4 = scmp.ge.s32.totalorder %s2604_s30, 2 }
  0x7c   : > { %300 = sbr.rel (%p1638_p4) target bundleno = 146 (0x92), region = 40 }
  0x83   : > { %s310_s22 = sand.u32 1, %s2604_s30   ;;  %s312_s20 = sand.u32 1, %s2600_s29  }
  0x84   : > { %s2309_s4 = smul.u32 384, %s312_s20  ;;  %s1691_s17 = sshll.u32 %s2604_s30, 11 }
  0x85   : > { %p3266_p3 = scmp.ne.s32.totalorder %s3256_s15, 0  ;;  %s320_s27 = scalar_lea.hbm %s3235_s5, %s1691_s17 }
  0x86   : > { %s2612_s11 = smov 4096   ;;  %s314_s13 = scalar_lea.vmem [#allocation7], %s2309_s4 }
  0x87   : > { %s2319_s26 = scalar_select %p3266_p3, [#allocation0], [#allocation14] }
  0x88   : > { %2320 = sst [smem:[#allocation13]] (%p3266_p3), %s2612_s11  ;;  %s333_s23 = sshll.u32 %s314_s13, 4  ;;  %s334_s23 = int_to_ptr.vmem [resolvable:$true] %s333_s23 }
  0x89   : > { %s325_s14 = sld [smem:[%s2319_s26]]   ;;  %s2613_s25 = smov 2048  }
  0x8a   : > { %2321 = sst [smem:[#allocation13 + $0x1]] (%p3266_p3), %s2613_s25  ;;  %s2614_s21 = smov 16  }
  0x8b   : > { %2322 = sst [smem:[#allocation13 + $0x2]] (%p3266_p3), %s2614_s21  ;;  %s2615_s8 = smov 128  }
  0x8c   : > { %2323 = sst [smem:[#allocation13 + $0x3]] (%p3266_p3), %s2615_s8  ;;  %s2616_s24 = smov 8  }
  0x8d   : > { %2324 = sst [smem:[#allocation13 + $0x4]] (%p3266_p3), %s2615_s8  ;;  %s311_s4 = scalar_lea.sflag [#allocation3], %s310_s22 }
  0x8e   : > { %2325 = sst [smem:[#allocation13 + $0x5]] (%p3266_p3), %s2616_s24  ;;  %s2617_s17 = smov [#allocation12]  }
  0x8f   : > { %s1641_s18 = sshll.u32 %s325_s14, 26 }
  0x90   : > { %s1642_s20 = sadd.s32 134217728, %s1641_s18 }
  0x91   : > { %2326 = dma.general (%p3266_p3), %s320_s27, 6144, %s334_s23, %s311_s4, %s2617_s17, [#allocation13], %s1642_s20, 0  }
  0x92 PF: > { %p3267_p2 = scmp.ne.s32.totalorder %s3262_s19, 0 }
  0x93   : > { %p3268_p5 = scmp.eq.s32.totalorder (!%p3267_p2), %s2687_s9, 0 }
  0x94   : > { %358 = sbr.rel (%p3267_p2) target bundleno = 1524 (0x5f4), region = 52 }
  0x9b   : > { %2567 = dma.done.wait (%p3268_p5), [#allocation3], 2048   ;;  %p3269_p6 = pmov %p3268_p5 }
  0x9c   : > { %p3270_p11 = pmov %p3268_p5 }
  0x9d   : > { %2569 = vsyncadd (%p3269_p6), [#allocation3], 4294965248 }
  0x9e   : > { %2571 = dma.done.wait (%p3270_p11), [#allocation6], 4096   ;;  %p3271_p12 = pmov %p3268_p5 }
  0x9f   : > { %s368_s15 = sand.u32 1, %s2687_s9   ;;  %s2872_s22 = sand.u32 1, %s2596_s28  }
  0xa0   : > { %2573 = vsyncadd (%p3271_p12), [#allocation6], 4294963200  ;;  %s2310_s19 = smul.u32 384, %s2872_s22  ;;  %s369_s26 = scalar_lea.sflag [#allocation3], %s368_s15 }
  0xa1   : > { %p3272_p13 = scmp.ne.s32.totalorder %s3257_s16, 0 }
  0xa2   : > { %s2875_s12 = scalar_lea.vmem [#allocation7], %s2310_s19 }
  0xa3   : > { %2575 = dma.done.wait (%p3272_p13), %s369_s26, 6144  }
  0xa4   : > { %2577 = vsyncadd (%p3272_p13), %s369_s26, 4294961152  ;;  %p3273_p0 = pmov %p3268_p5 }
  0xa6   : > { %2579 = dma.done.wait (%p3273_p0), [#allocation6], 2048   ;;  %p3274_p7 = pmov %p3273_p0 }
  0xa7   : > { %p3275_p8 = pmov %p3273_p0 }
  0xa8   : > { %2581 = vsyncadd (%p3274_p7), [#allocation6], 4294965248 }
  0xa9   : > { %2583 = dma.done.wait (%p3275_p8), [#allocation10], 2048   ;;  %p3276_p9 = pmov %p3273_p0 }
  0xaa   : > { %p416_p10 = scmp.lt.s32.totalorder %s2687_s9, 1  ;;  %v2894_v0 = vld [vmem:[#allocation2] sm:$0xff]  ;;  %v2898_v2 = vld [vmem:[#allocation2 + $0x10] sm:$0xff]  ;;  %v2904_v5 = vld [vmem:[#allocation2 + $0x8] sm:$0xff]  ;;  %s1648_s20 = sshll.u32 %s2872_s22, 7 }
  0xab   : > { %2585 = vsyncadd (%p3276_p9), [#allocation10], 4294965248  ;;  %v2906_v6 = vld [vmem:[#allocation2 + $0x18] sm:$0xff]  ;;  %1941 = vmatprep.mubr.f32.mxu1 %v2894_v0  ;;  %v2913_v9 = vld [vmem:[#allocation2 + $0x20] sm:$0xff]  ;;  %s3161_s4 = scalar_lea.vmem [#allocation11], %s1648_s20  ;;  %s1692_s17 = sshll.u32 %s2687_s9, 11 }
  0xac   : > { %s417_s10 = scalar_select %p416_p10, %s2687_s9, 1  ;;  %v2915_v10 = vld [vmem:[#allocation2 + $0x28] sm:$0xff]  ;;  %v584_v11 = vld [vmem:[#allocation5] sm:$0xff]  ;;  %v586_v13 = vld [vmem:[#allocation5 + $0x10] sm:$0xff] }
  0xad   : > { %v585_v12 = vld [vmem:[#allocation5 + $0x8] sm:$0xff]  ;;  %v587_v14 = vld [vmem:[#allocation5 + $0x18] sm:$0xff]  ;;  %v2921_v18 = vld [vmem:[#allocation2 + $0x30] sm:$0xff]  ;;  %s3277_s15 = sld [smem:[#allocation24_spill]]  ;;  %s1512_s19 = sshll.u32 %s3161_s4, 4  ;;  %s3184_s19 = int_to_ptr.vmem [resolvable:$true] %s1512_s19 }
  0xae   : > { %s418_s16 = scalar_lea.vmem %s3231_s1, %s417_s10  ;;  %v2133_v17 = vpack.c.bf16 %v585_v12, %v584_v11  ;;  %v2923_v19 = vld [vmem:[#allocation2 + $0x38] sm:$0xff]  ;;  %v2137_v20 = vpack.c.bf16 %v587_v14, %v586_v13  ;;  %v588_v21 = vld [vmem:[#allocation5 + $0x20] sm:$0xff]  ;;  %v589_v22 = vld [vmem:[#allocation5 + $0x28] sm:$0xff]  ;;  %s3278_s10 = sld [smem:[#allocation27_spill]] }
  0xaf   : > { %v2896_v1 = vld [vmem:[%s418_s16] ss:$0 sm:$0xff]  ;;  %v2931_v26 = vld [vmem:[#allocation2 + $0x48] sm:$0xff]  ;;  %v2141_v27 = vpack.c.bf16 %v589_v22, %v588_v21  ;;  %v590_v28 = vld [vmem:[#allocation5 + $0x30] sm:$0xff]  ;;  %s1499_s9 = scalar_lea.sflag [#allocation4], %s2872_s22  ;;  %s2522_s11 = scalar_lea.vmem %s3184_s19, 2048 }
  0xb0   : > { %v444_v3 = vmul.f32 %v2896_v1, %v2894_v0  ;;  %v446_v4 = vmul.f32 %v2896_v1, %v2898_v2  ;;  %v445_v7 = vmul.f32 %v2896_v1, %v2904_v5  ;;  %v447_v8 = vmul.f32 %v2896_v1, %v2906_v6  ;;  %2134 = vmatprep.subr.bf16.mxu0 %v2133_v17  ;;  %v2929_v25 = vld [vmem:[#allocation2 + $0x40] sm:$0xff]  ;;  %v591_v29 = vld [vmem:[#allocation5 + $0x38] sm:$0xff]  ;;  %v2937_v32 = vld [vmem:[#allocation2 + $0x50] sm:$0xff]  ;;  %p2523_p1 = scmp.ne.s32.totalorder %s3184_s19, %s2522_s11  ;;  %s2618_s16 = smov [#allocation11]  }
  0xb1   : > { %v448_v15 = vmul.f32 %v2896_v1, %v2913_v9  ;;  %v449_v16 = vmul.f32 %v2896_v1, %v2915_v10  ;;  %2136 = vmatpush3.bf16.msra.mxu0 %v2133_v17  ;;  %v450_v23 = vmul.f32 %v2896_v1, %v2921_v18  ;;  %v451_v24 = vmul.f32 %v2896_v1, %v2923_v19  ;;  %v2939_v33 = vld [vmem:[#allocation2 + $0x58] sm:$0xff]  ;;  %v592_v35 = vld [vmem:[#allocation5 + $0x40] sm:$0xff]  ;;  %v593_v36 = vld [vmem:[#allocation5 + $0x48] sm:$0xff]  ;;  %s2526_s14 = sshll.u32 %s2618_s16, 4  ;;  %s2527_s14 = int_to_ptr.vmem [resolvable:$false] %s2526_s14 }
  0xb2   : > { %460 = vadd.xlane.f32.xlu0 %v444_v3  ;;  %464 = vadd.xlane.f32.xlu1 %v446_v4  ;;  %v452_v30 = vmul.f32 %v2896_v1, %v2929_v25  ;;  %v453_v31 = vmul.f32 %v2896_v1, %v2931_v26  ;;  %v2145_v34 = vpack.c.bf16 %v591_v29, %v590_v28  ;;  %v2945_v39 = vld [vmem:[#allocation2 + $0x60] sm:$0xff]  ;;  %v2947_v40 = vld [vmem:[#allocation2 + $0x68] sm:$0xff]  ;;  %v594_v42 = vld [vmem:[#allocation5 + $0x50] sm:$0xff]  ;;  %s2528_s13 = scalar_lea.vmem %s2527_s14, 4096  ;;  %p2529_p6 = scmp.lt.s32.totalorder %s3184_s19, %s2527_s14 }
  0xb3   : > { %2138 = vmatprep.subr.bf16.mxu0 %v2137_v20  ;;  %v454_v37 = vmul.f32 %v2896_v1, %v2937_v32  ;;  %v455_v38 = vmul.f32 %v2896_v1, %v2939_v33  ;;  %v2149_v41 = vpack.c.bf16 %v593_v36, %v592_v35  ;;  %v595_v43 = vld [vmem:[#allocation5 + $0x58] sm:$0xff]  ;;  %v456_v44 = vmul.f32 %v2896_v1, %v2945_v39  ;;  %v2953_v46 = vld [vmem:[#allocation2 + $0x70] sm:$0xff]  ;;  %v596_v49 = vld [vmem:[#allocation5 + $0x60] sm:$0xff]  ;;  %p3279_p3 = scmp.ne.s32.totalorder %s3277_s15, 0  ;;  %p2530_p11 = scmp.lt.s32.totalorder %s2528_s13, %s2522_s11 }
  0xb4   : > { %v457_v45 = vmul.f32 %v2896_v1, %v2947_v40  ;;  %v2955_v47 = vld [vmem:[#allocation2 + $0x78] sm:$0xff]  ;;  %v2153_v48 = vpack.c.bf16 %v595_v43, %v594_v42  ;;  %v597_v50 = vld [vmem:[#allocation5 + $0x68] sm:$0xff]  ;;  %v458_v51 = vmul.f32 %v2896_v1, %v2953_v46  ;;  %v598_v54 = vld [vmem:[#allocation5 + $0x70] sm:$0xff]  ;;  %s3182_s27 = scalar_lea.hbm %s3278_s10, %s1692_s17 }
  0xb5   : > { %2140 = vmatpush3.bf16.msra.mxu0 %v2137_v20  ;;  %v459_v52 = vmul.f32 %v2896_v1, %v2955_v47  ;;  %v2157_v53 = vpack.c.bf16 %v597_v50, %v596_v49  ;;  %v599_v55 = vld [vmem:[#allocation5 + $0x78] sm:$0xff]  ;;  %v2964_v57 = vld [vmem:[%s3232_s2] ss:$0 sm:$0xff]  ;;  %v554_v17 = vld [vmem:[%s2875_s12 + $0x10] sm:$0xff]  ;;  %p2524_p2 = pnand %p2523_p1, %p3279_p3  ;;  %p2531_p12 = por %p2530_p11, %p2529_p6 }
  0xb6   : > { %462 = vadd.xlane.f32.xlu0 %v445_v7  ;;  %466 = vadd.xlane.f32.xlu1 %v447_v8  ;;  %v2161_v56 = vpack.c.bf16 %v599_v55, %v598_v54  ;;  %v2969_v59 = vld [vmem:[%s3233_s3] ss:$0 sm:$0xff]  ;;  %v553_v22 = vld [vmem:[%s2875_s12 + $0x8] sm:$0xff]  ;;  %v555_v29 = vld [vmem:[%s2875_s12 + $0x18] sm:$0xff] }
  0xb7   : > { %2142 = vmatprep.subr.bf16.mxu0 %v2141_v27  ;;  %v552_v7 = vld [vmem:[%s2875_s12] sm:$0xff]  ;;  %v558_v55 = vld [vmem:[%s2875_s12 + $0x30] sm:$0xff]  ;;  %p2525_p5 = pneg %p2524_p2 }
  0xb9   : > { %2144 = vmatpush3.bf16.msra.mxu0 %v2141_v27  ;;  %p2532_p13 = pnand %p2531_p12, %p2525_p5 }
  0xba   : > { %468 = vadd.xlane.f32.xlu0 %v448_v15  ;;  %470 = vadd.xlane.f32.xlu1 %v449_v16 }
  0xbb   : > { %2146 = vmatprep.subr.bf16.mxu0 %v2145_v34 }
  0xbd   : > { %2148 = vmatpush3.bf16.msra.mxu0 %v2145_v34 }
  0xbe   : > { %472 = vadd.xlane.f32.xlu0 %v450_v23  ;;  %474 = vadd.xlane.f32.xlu1 %v451_v24 }
  0xbf   : > { %2150 = vmatprep.subr.bf16.mxu0 %v2149_v41 }
  0xc1   : > { %2152 = vmatpush3.bf16.msra.mxu0 %v2149_v41  ;;  %v556_v41 = vld [vmem:[%s2875_s12 + $0x20] sm:$0xff] }
  0xc2   : > { %476 = vadd.xlane.f32.xlu0 %v452_v30  ;;  %478 = vadd.xlane.f32.xlu1 %v453_v31 }
  0xc3   : > { %2154 = vmatprep.subr.bf16.mxu0 %v2153_v48 }
  0xc5   : > { %2156 = vmatpush3.bf16.msra.mxu0 %v2153_v48  ;;  %v557_v48 = vld [vmem:[%s2875_s12 + $0x28] sm:$0xff] }
  0xc6   : > { %480 = vadd.xlane.f32.xlu0 %v454_v37  ;;  %482 = vadd.xlane.f32.xlu1 %v455_v38 }
  0xc7   : > { %2158 = vmatprep.subr.bf16.mxu0 %v2157_v53 }
  0xc9   : > { %2160 = vmatpush3.bf16.msra.mxu0 %v2157_v53 }
  0xca   : > { %484 = vadd.xlane.f32.xlu0 %v456_v44  ;;  %486 = vadd.xlane.f32.xlu1 %v457_v45 }
  0xcb   : > { %2162 = vmatprep.subr.bf16.mxu0 %v2161_v56 }
  0xcd   : > { %2164 = vmatpush3.bf16.msra.mxu0 %v2161_v56 }
  0xce   : > { %488 = vadd.xlane.f32.xlu0 %v458_v51  ;;  %490 = vadd.xlane.f32.xlu1 %v459_v52 }
 0x13f   : > { %v461_v58 = vpop.xlane.xlu0 %460  ;;  %v465_v60 = vpop.xlane.xlu1 %464 }
 0x140   : > { %v499_v61 = vmul.f32 %v2964_v57, %v461_v58  ;;  %v501_v62 = vmul.f32 %v2964_v57, %v465_v60 }
 0x142   : > { %v522_v63 = vadd.f32 %v2969_v59, %v501_v62  ;;  %v520_v1 = vadd.f32 %v2969_v59, %v499_v61  ;;  %v559_v62 = vld [vmem:[%s2875_s12 + $0x38] sm:$0xff] }
 0x143   : > { %v463_v3 = vpop.xlane.xlu0 %462  ;;  %v467_v4 = vpop.xlane.xlu1 %466 }
 0x144   : > { %v500_v8 = vmul.f32 %v2964_v57, %v463_v3  ;;  %v502_v11 = vmul.f32 %v2964_v57, %v467_v4  ;;  %v536_v12 = vmax.f32 %v520_v1, 0.0  ;;  %v538_v13 = vmax.f32 %v522_v63, 0.0 }
 0x146   : > { %v521_v14 = vadd.f32 %v2969_v59, %v500_v8  ;;  %v523_v15 = vadd.f32 %v2969_v59, %v502_v11  ;;  %v568_v16 = vmul.f32 %v552_v7, %v536_v12  ;;  %v570_v30 = vmul.f32 %v554_v17, %v538_v13  ;;  %v560_v11 = vld [vmem:[%s2875_s12 + $0x40] sm:$0xff] }
 0x147   : > { %v469_v20 = vpop.xlane.xlu0 %468  ;;  %v471_v21 = vpop.xlane.xlu1 %470 }
 0x148   : > { %v537_v23 = vmax.f32 %v521_v14, 0.0  ;;  %v539_v24 = vmax.f32 %v523_v15, 0.0  ;;  %1885 = vmatprep.mubr.f32.mxu0 %v568_v16  ;;  %v503_v27 = vmul.f32 %v2964_v57, %v469_v20  ;;  %v504_v28 = vmul.f32 %v2964_v57, %v471_v21  ;;  %v561_v16 = vld [vmem:[%s2875_s12 + $0x48] sm:$0xff] }
 0x14a   : > { %v524_v31 = vadd.f32 %v2969_v59, %v503_v27  ;;  %v525_v34 = vadd.f32 %v2969_v59, %v504_v28  ;;  %v569_v35 = vmul.f32 %v553_v22, %v537_v23  ;;  %v571_v38 = vmul.f32 %v555_v29, %v539_v24  ;;  %v562_v27 = vld [vmem:[%s2875_s12 + $0x50] sm:$0xff] }
 0x14b   : > { %v473_v36 = vpop.xlane.xlu0 %472  ;;  %v475_v37 = vpop.xlane.xlu1 %474 }
 0x14c   : > { %v540_v42 = vmax.f32 %v524_v31, 0.0  ;;  %v541_v43 = vmax.f32 %v525_v34, 0.0  ;;  %1886 = vmatmul.mubr.f32.vlgmr.msra.gmra.mrb[0].mxu0 %v569_v35  ;;  %v505_v44 = vmul.f32 %v2964_v57, %v473_v36  ;;  %v506_v45 = vmul.f32 %v2964_v57, %v475_v37  ;;  %v563_v34 = vld [vmem:[%s2875_s12 + $0x58] sm:$0xff] }
 0x14d   : > { %1888 = vmatprep.mubr.f32.mxu0 %v570_v30 }
 0x14e   : > { %v526_v49 = vadd.f32 %v2969_v59, %v505_v44  ;;  %v527_v50 = vadd.f32 %v2969_v59, %v506_v45  ;;  %v572_v51 = vmul.f32 %v556_v41, %v540_v42  ;;  %v573_v54 = vmul.f32 %v557_v48, %v541_v43  ;;  %v564_v43 = vld [vmem:[%s2875_s12 + $0x60] sm:$0xff] }
 0x14f   : > { %v477_v52 = vpop.xlane.xlu0 %476  ;;  %v479_v53 = vpop.xlane.xlu1 %478 }
 0x150   : > { %v542_v56 = vmax.f32 %v526_v49, 0.0  ;;  %v543_v58 = vmax.f32 %v527_v50, 0.0  ;;  %1889 = vmatmul.mubr.f32.gmra.mrb[2].mxu0 %v571_v38  ;;  %v507_v60 = vmul.f32 %v2964_v57, %v477_v52  ;;  %v508_v61 = vmul.f32 %v2964_v57, %v479_v53  ;;  %v565_v50 = vld [vmem:[%s2875_s12 + $0x68] sm:$0xff] }
 0x151   : > { %1891 = vmatprep.mubr.f32.mxu0 %v572_v51 }
 0x152   : > { %v528_v63 = vadd.f32 %v2969_v59, %v507_v60  ;;  %v529_v1 = vadd.f32 %v2969_v59, %v508_v61  ;;  %v574_v3 = vmul.f32 %v558_v55, %v542_v56  ;;  %v575_v8 = vmul.f32 %v559_v62, %v543_v58  ;;  %v567_v60 = vld [vmem:[%s2875_s12 + $0x78] sm:$0xff] }
 0x153   : > { %v481_v4 = vpop.xlane.xlu0 %480  ;;  %v483_v7 = vpop.xlane.xlu1 %482 }
 0x154   : > { %v544_v12 = vmax.f32 %v528_v63, 0.0  ;;  %v545_v13 = vmax.f32 %v529_v1, 0.0  ;;  %1892 = vmatmul.mubr.f32.gmra.mrb[4].mxu0 %v573_v54  ;;  %v509_v14 = vmul.f32 %v2964_v57, %v481_v4  ;;  %v510_v15 = vmul.f32 %v2964_v57, %v483_v7  ;;  %v566_v54 = vld [vmem:[%s2875_s12 + $0x70] sm:$0xff]  ;;  %v946_v63 = vld [vmem:[#allocation5 + $0x88] sm:$0xff]  ;;  %v948_v4 = vld [vmem:[#allocation5 + $0x98] sm:$0xff] }
 0x155   : > { %1894 = vmatprep.mubr.f32.mxu0 %v574_v3  ;;  %v947_v1 = vld [vmem:[#allocation5 + $0x90] sm:$0xff] }
 0x156   : > { %v530_v17 = vadd.f32 %v2969_v59, %v509_v14  ;;  %v531_v20 = vadd.f32 %v2969_v59, %v510_v15  ;;  %v576_v21 = vmul.f32 %v560_v11, %v544_v12  ;;  %v577_v24 = vmul.f32 %v561_v16, %v545_v13  ;;  %v951_v12 = vld [vmem:[#allocation5 + $0xb0] sm:$0xff]  ;;  %v952_v13 = vld [vmem:[#allocation5 + $0xb8] sm:$0xff]  ;;  %v953_v15 = vld [vmem:[#allocation5 + $0xc0] sm:$0xff] }
 0x157   : > { %v485_v22 = vpop.xlane.xlu0 %484  ;;  %v487_v23 = vpop.xlane.xlu1 %486  ;;  %v2201_v7 = vpack.c.bf16 %v948_v4, %v947_v1  ;;  %v2209_v14 = vpack.c.bf16 %v952_v13, %v951_v12  ;;  %v954_v16 = vld [vmem:[#allocation5 + $0xc8] sm:$0xff] }
 0x158   : > { %v546_v28 = vmax.f32 %v530_v17, 0.0  ;;  %v547_v29 = vmax.f32 %v531_v20, 0.0  ;;  %1895 = vmatmul.mubr.f32.gmra.mrb[6].mxu0 %v575_v8  ;;  %v511_v30 = vmul.f32 %v2964_v57, %v485_v22  ;;  %v512_v31 = vmul.f32 %v2964_v57, %v487_v23  ;;  %v950_v8 = vld [vmem:[#allocation5 + $0xa8] sm:$0xff]  ;;  %v955_v20 = vld [vmem:[#allocation5 + $0xd0] sm:$0xff] }
 0x159   : > { %1897 = vmatprep.mubr.f32.mxu0 %v576_v21  ;;  %v2213_v17 = vpack.c.bf16 %v954_v16, %v953_v15  ;;  %v956_v21 = vld [vmem:[#allocation5 + $0xd8] sm:$0xff] }
 0x15a   : > { %v532_v35 = vadd.f32 %v2969_v59, %v511_v30  ;;  %v533_v36 = vadd.f32 %v2969_v59, %v512_v31  ;;  %v578_v37 = vmul.f32 %v562_v27, %v546_v28  ;;  %v579_v42 = vmul.f32 %v563_v34, %v547_v29 }
 0x15b   : > { %v489_v38 = vpop.xlane.xlu0 %488  ;;  %v491_v41 = vpop.xlane.xlu1 %490  ;;  %v2217_v22 = vpack.c.bf16 %v956_v21, %v955_v20  ;;  %v1655_v20 = vld [vmem:[%s2875_s12 + $0x90] sm:$0xff]  ;;  %v1656_v21 = vld [vmem:[%s2875_s12 + $0x98] sm:$0xff] }
 0x15c   : > { %v548_v44 = vmax.f32 %v532_v35, 0.0  ;;  %v549_v45 = vmax.f32 %v533_v36, 0.0  ;;  %1898 = vmatmul.mubr.f32.gmra.mrb[8].mxu0 %v577_v24  ;;  %v513_v48 = vmul.f32 %v2964_v57, %v489_v38  ;;  %v514_v49 = vmul.f32 %v2964_v57, %v491_v41  ;;  %v945_v57 = vld [vmem:[#allocation5 + $0x80] sm:$0xff] }
 0x15d   : > { %1900 = vmatprep.mubr.f32.mxu0 %v578_v37  ;;  %v2197_v3 = vpack.c.bf16 %v946_v63, %v945_v57  ;;  %v3038_v57 = vld [vmem:[%s3233_s3 + $0x1] ss:$0 sm:$0xff] }
 0x15e   : > { %v534_v51 = vadd.f32 %v2969_v59, %v513_v48  ;;  %v535_v52 = vadd.f32 %v2969_v59, %v514_v49  ;;  %v580_v53 = vmul.f32 %v564_v43, %v548_v44  ;;  %v581_v58 = vmul.f32 %v565_v50, %v549_v45  ;;  %v949_v59 = vld [vmem:[#allocation5 + $0xa0] sm:$0xff] }
 0x15f   : > { %2198 = vmatprep.subr.bf16.mxu0 %v2197_v3  ;;  %v2205_v11 = vpack.c.bf16 %v950_v8, %v949_v59  ;;  %v1654_v59 = vld [vmem:[%s2875_s12 + $0x88] sm:$0xff] }
 0x160   : > { %v550_v55 = vmax.f32 %v534_v51, 0.0  ;;  %v551_v56 = vmax.f32 %v535_v52, 0.0  ;;  %1901 = vmatmul.mubr.f32.gmra.mrb[10].mxu0 %v579_v42 }
 0x161   : > { %1903 = vmatprep.mubr.f32.mxu0 %v580_v53  ;;  %2200 = vmatpush3.bf16.msra.mxu0 %v2197_v3 }
 0x162   : > { %v582_v61 = vmul.f32 %v566_v54, %v550_v55  ;;  %v583_v62 = vmul.f32 %v567_v60, %v551_v56  ;;  %2202 = vmatprep.subr.bf16.mxu0 %v2201_v7  ;;  %v957_v55 = vld [vmem:[#allocation5 + $0xe0] sm:$0xff]  ;;  %v958_v56 = vld [vmem:[#allocation5 + $0xe8] sm:$0xff]  ;;  %v959_v60 = vld [vmem:[#allocation5 + $0xf0] sm:$0xff] }
 0x164   : > { %1904 = vmatmul.mubr.f32.gmra.mrb[12].mxu0 %v581_v58  ;;  %v2221_v58 = vpack.c.bf16 %v958_v56, %v957_v55 }
 0x165   : > { %1906 = vmatprep.mubr.f32.mxu0 %v582_v61  ;;  %2204 = vmatpush3.bf16.msra.mxu0 %v2201_v7  ;;  %v960_v61 = vld [vmem:[#allocation5 + $0xf8] sm:$0xff]  ;;  %v1653_v7 = vld [vmem:[%s2875_s12 + $0x80] sm:$0xff] }
 0x166   : > { %2206 = vmatprep.subr.bf16.mxu0 %v2205_v11 }
 0x168   : > { %1907 = vmatmul.mubr.f32.gmra.mrb[14].mxu0 %v583_v62  ;;  %v2225_v62 = vpack.c.bf16 %v960_v61, %v959_v60  ;;  %v1661_v60 = vld [vmem:[%s2875_s12 + $0xc0] sm:$0xff]  ;;  %v1662_v61 = vld [vmem:[%s2875_s12 + $0xc8] sm:$0xff] }
 0x169   : > { %2208 = vmatpush3.bf16.msra.mxu0 %v2205_v11 }
 0x16a   : > { %2210 = vmatprep.subr.bf16.mxu0 %v2209_v14 }
 0x16d   : > { %2212 = vmatpush3.bf16.msra.mxu0 %v2209_v14 }
 0x16e   : > { %2214 = vmatprep.subr.bf16.mxu0 %v2213_v17 }
 0x171   : > { %2216 = vmatpush3.bf16.msra.mxu0 %v2213_v17 }
 0x172   : > { %2218 = vmatprep.subr.bf16.mxu0 %v2217_v22 }
 0x175   : > { %2220 = vmatpush3.bf16.msra.mxu0 %v2217_v22 }
 0x176   : > { %2222 = vmatprep.subr.bf16.mxu0 %v2221_v58 }
 0x179   : > { %2224 = vmatpush3.bf16.msra.mxu0 %v2221_v58 }
 0x17a   : > { %2226 = vmatprep.subr.bf16.mxu0 %v2225_v62 }
 0x17d   : > { %2228 = vmatpush3.bf16.msra.mxu0 %v2225_v62 }
 0x21f   : > { %v1887_v23 = vpop.f32.mrb[0].mxu0 }
 0x220   : > { %v666_v24 = vpop.f32.mrb[1].mxu0 }
 0x221   : > { %v2165_v27 = vpack.c.bf16 %v1887_v23, %v666_v24 }
 0x223   : > { %v1890_v28 = vpop.f32.mrb[2].mxu0  ;;  %2166 = vmatprep.subr.bf16.mxu1 %v2165_v27 }
 0x224   : > { %v676_v29 = vpop.f32.mrb[3].mxu0  ;;  %2168 = vmatpush3.bf16.msra.mxu1 %v2165_v27 }
 0x225   : > { %v2169_v30 = vpack.c.bf16 %v1890_v28, %v676_v29 }
 0x227   : > { %v1893_v31 = vpop.f32.mrb[4].mxu0  ;;  %2170 = vmatprep.subr.bf16.mxu1 %v2169_v30 }
 0x228   : > { %v686_v34 = vpop.f32.mrb[5].mxu0  ;;  %2172 = vmatpush3.bf16.msra.mxu1 %v2169_v30 }
 0x229   : > { %v2173_v35 = vpack.c.bf16 %v1893_v31, %v686_v34  ;;  %v1657_v34 = vld [vmem:[%s2875_s12 + $0xa0] sm:$0xff] }
 0x22b   : > { %v1896_v36 = vpop.f32.mrb[6].mxu0  ;;  %2174 = vmatprep.subr.bf16.mxu1 %v2173_v35 }
 0x22c   : > { %v696_v37 = vpop.f32.mrb[7].mxu0  ;;  %2176 = vmatpush3.bf16.msra.mxu1 %v2173_v35  ;;  %v1658_v35 = vld [vmem:[%s2875_s12 + $0xa8] sm:$0xff] }
 0x22d   : > { %v2177_v38 = vpack.c.bf16 %v1896_v36, %v696_v37 }
 0x22f   : > { %v1899_v41 = vpop.f32.mrb[8].mxu0  ;;  %2178 = vmatprep.subr.bf16.mxu1 %v2177_v38 }
 0x230   : > { %v706_v42 = vpop.f32.mrb[9].mxu0  ;;  %2180 = vmatpush3.bf16.msra.mxu1 %v2177_v38 }
 0x231   : > { %v2181_v43 = vpack.c.bf16 %v1899_v41, %v706_v42 }
 0x233   : > { %v1902_v44 = vpop.f32.mrb[10].mxu0  ;;  %2182 = vmatprep.subr.bf16.mxu1 %v2181_v43 }
 0x234   : > { %v716_v45 = vpop.f32.mrb[11].mxu0  ;;  %2184 = vmatpush3.bf16.msra.mxu1 %v2181_v43 }
 0x235   : > { %v2185_v48 = vpack.c.bf16 %v1902_v44, %v716_v45 }
 0x237   : > { %v1905_v49 = vpop.f32.mrb[12].mxu0  ;;  %2186 = vmatprep.subr.bf16.mxu1 %v2185_v48 }
 0x238   : > { %v726_v50 = vpop.f32.mrb[13].mxu0  ;;  %2188 = vmatpush3.bf16.msra.mxu1 %v2185_v48  ;;  %v1659_v48 = vld [vmem:[%s2875_s12 + $0xb0] sm:$0xff] }
 0x239   : > { %v2189_v51 = vpack.c.bf16 %v1905_v49, %v726_v50  ;;  %v1660_v49 = vld [vmem:[%s2875_s12 + $0xb8] sm:$0xff] }
 0x23b   : > { %v1908_v52 = vpop.f32.mrb[14].mxu0  ;;  %2190 = vmatprep.subr.bf16.mxu1 %v2189_v51 }
 0x23c   : > { %v736_v53 = vpop.f32.mrb[15].mxu0  ;;  %2192 = vmatpush3.bf16.msra.mxu1 %v2189_v51 }
 0x23d   : > { %v2193_v54 = vpack.c.bf16 %v1908_v52, %v736_v53 }
 0x23f   : > { %2194 = vmatprep.subr.bf16.mxu1 %v2193_v54 }
 0x240   : > { %2196 = vmatpush3.bf16.msra.mxu1 %v2193_v54 }
 0x243   : > { %1942 = vmatmul.mubr.f32.vlgmr.msra.gmra.mrb[0].mxu1 %v2904_v5 }
 0x244   : > { %1944 = vmatprep.mubr.f32.mxu1 %v2898_v2 }
 0x247   : > { %1945 = vmatmul.mubr.f32.gmra.mrb[2].mxu1 %v2906_v6 }
 0x248   : > { %1947 = vmatprep.mubr.f32.mxu1 %v2913_v9 }
 0x24b   : > { %1948 = vmatmul.mubr.f32.gmra.mrb[4].mxu1 %v2915_v10 }
 0x24c   : > { %1950 = vmatprep.mubr.f32.mxu1 %v2921_v18 }
 0x24f   : > { %1951 = vmatmul.mubr.f32.gmra.mrb[6].mxu1 %v2923_v19 }
 0x250   : > { %1953 = vmatprep.mubr.f32.mxu1 %v2929_v25 }
 0x253   : > { %1954 = vmatmul.mubr.f32.gmra.mrb[8].mxu1 %v2931_v26 }
 0x254   : > { %1956 = vmatprep.mubr.f32.mxu1 %v2937_v32 }
 0x257   : > { %1957 = vmatmul.mubr.f32.gmra.mrb[10].mxu1 %v2939_v33 }
 0x258   : > { %1959 = vmatprep.mubr.f32.mxu1 %v2945_v39 }
 0x25b   : > { %1960 = vmatmul.mubr.f32.gmra.mrb[12].mxu1 %v2947_v40 }
 0x25c   : > { %1962 = vmatprep.mubr.f32.mxu1 %v2953_v46 }
 0x25f   : > { %1963 = vmatmul.mubr.f32.gmra.mrb[14].mxu1 %v2955_v47 }
 0x260   : > { %2053 = vmatprep.mubr.f32.mxu1 %v2894_v0 }
 0x316   : > { %v1943_v63 = vpop.f32.mrb[0].mxu1 }
 0x317   : > { %v822_v0 = vadd.f32 %v1943_v63, %v3038_v57  ;;  %v816_v1 = vpop.f32.mrb[1].mxu1 }
 0x318   : > { %v817_v3 = vadd.f32 %v3038_v57, %v816_v1 }
 0x319   : > { %v896_v4 = vmax.f32 %v822_v0, 0.0 }
 0x31a   : > { %v895_v8 = vmax.f32 %v817_v3, 0.0  ;;  %v1946_v11 = vpop.f32.mrb[2].mxu1 }
 0x31b   : > { %v832_v12 = vadd.f32 %v1946_v11, %v3038_v57  ;;  %v826_v13 = vpop.f32.mrb[3].mxu1  ;;  %v929_v16 = vmul.f32 %v1654_v59, %v896_v4  ;;  %v1664_v11 = vld [vmem:[%s2875_s12 + $0xd8] sm:$0xff] }
 0x31c   : > { %v928_v14 = vmul.f32 %v1653_v7, %v895_v8  ;;  %v827_v15 = vadd.f32 %v3038_v57, %v826_v13  ;;  %v1663_v8 = vld [vmem:[%s2875_s12 + $0xd0] sm:$0xff] }
 0x31d   : > { %v898_v17 = vmax.f32 %v832_v12, 0.0 }
 0x31e   : > { %v897_v22 = vmax.f32 %v827_v15, 0.0  ;;  %v1949_v23 = vpop.f32.mrb[4].mxu1  ;;  %1997 = vmatprep.mubr.f32.mxu0 %v928_v14 }
 0x31f   : > { %v842_v24 = vadd.f32 %v1949_v23, %v3038_v57  ;;  %v836_v27 = vpop.f32.mrb[5].mxu1  ;;  %1998 = vmatmul.mubr.f32.vlgmr.msra.gmra.mrb[16].mxu0 %v929_v16  ;;  %v931_v30 = vmul.f32 %v1656_v21, %v898_v17  ;;  %v1666_v23 = vld [vmem:[%s2875_s12 + $0xe8] sm:$0xff] }
 0x320   : > { %v930_v28 = vmul.f32 %v1655_v20, %v897_v22  ;;  %v837_v29 = vadd.f32 %v3038_v57, %v836_v27  ;;  %v1665_v22 = vld [vmem:[%s2875_s12 + $0xe0] sm:$0xff] }
 0x321   : > { %v900_v31 = vmax.f32 %v842_v24, 0.0 }
 0x322   : > { %v899_v36 = vmax.f32 %v837_v29, 0.0  ;;  %v1952_v37 = vpop.f32.mrb[6].mxu1  ;;  %2000 = vmatprep.mubr.f32.mxu0 %v930_v28 }
 0x323   : > { %v852_v38 = vadd.f32 %v1952_v37, %v3038_v57  ;;  %v846_v41 = vpop.f32.mrb[7].mxu1  ;;  %2001 = vmatmul.mubr.f32.gmra.mrb[18].mxu0 %v931_v30  ;;  %v933_v44 = vmul.f32 %v1658_v35, %v900_v31  ;;  %v1668_v37 = vld [vmem:[%s2875_s12 + $0xf8] sm:$0xff] }
 0x324   : > { %v932_v42 = vmul.f32 %v1657_v34, %v899_v36  ;;  %v847_v43 = vadd.f32 %v3038_v57, %v846_v41  ;;  %v1667_v36 = vld [vmem:[%s2875_s12 + $0xf0] sm:$0xff] }
 0x325   : > { %v902_v45 = vmax.f32 %v852_v38, 0.0 }
 0x326   : > { %v901_v50 = vmax.f32 %v847_v43, 0.0  ;;  %v1955_v51 = vpop.f32.mrb[8].mxu1  ;;  %2003 = vmatprep.mubr.f32.mxu0 %v932_v42  ;;  %v1305_v43 = vld [vmem:[#allocation8] sm:$0xff] }
 0x327   : > { %v862_v52 = vadd.f32 %v1955_v51, %v3038_v57  ;;  %v856_v53 = vpop.f32.mrb[9].mxu1  ;;  %2004 = vmatmul.mubr.f32.gmra.mrb[20].mxu0 %v933_v44  ;;  %v935_v56 = vmul.f32 %v1660_v49, %v902_v45  ;;  %v1306_v44 = vld [vmem:[#allocation8 + $0x8] sm:$0xff]  ;;  %v1307_v45 = vld [vmem:[#allocation8 + $0x10] sm:$0xff]  ;;  %v1308_v49 = vld [vmem:[#allocation8 + $0x18] sm:$0xff] }
 0x328   : > { %v934_v54 = vmul.f32 %v1659_v48, %v901_v50  ;;  %v857_v55 = vadd.f32 %v3038_v57, %v856_v53  ;;  %v3072_v48 = vpack.c.bf16 %v1306_v44, %v1305_v43  ;;  %v3074_v50 = vpack.c.bf16 %v1308_v49, %v1307_v45  ;;  %v1310_v51 = vld [vmem:[#allocation8 + $0x28] sm:$0xff]  ;;  %v1311_v53 = vld [vmem:[#allocation8 + $0x30] sm:$0xff]  ;;  %v1673_v44 = vld [vmem:[%s2875_s12 + $0x118] sm:$0xff] }
 0x329   : > { %v904_v58 = vmax.f32 %v862_v52, 0.0  ;;  %v1672_v43 = vld [vmem:[%s2875_s12 + $0x110] sm:$0xff] }
 0x32a   : > { %v903_v62 = vmax.f32 %v857_v55, 0.0  ;;  %v1958_v63 = vpop.f32.mrb[10].mxu1  ;;  %2006 = vmatprep.mubr.f32.mxu0 %v934_v54  ;;  %2262 = vmatprep.subr.bf16.mxu0 %v3072_v48  ;;  %v1312_v54 = vld [vmem:[#allocation8 + $0x38] sm:$0xff] }
 0x32b   : > { %v872_v0 = vadd.f32 %v1958_v63, %v3038_v57  ;;  %v866_v1 = vpop.f32.mrb[11].mxu1  ;;  %2007 = vmatmul.mubr.f32.gmra.mrb[22].mxu0 %v935_v56  ;;  %v937_v7 = vmul.f32 %v1662_v61, %v904_v58  ;;  %v3083_v55 = vpack.c.bf16 %v1312_v54, %v1311_v53  ;;  %v1313_v56 = vld [vmem:[#allocation8 + $0x40] sm:$0xff]  ;;  %v1314_v58 = vld [vmem:[#allocation8 + $0x48] sm:$0xff]  ;;  %v1315_v61 = vld [vmem:[#allocation8 + $0x50] sm:$0xff] }
 0x32c   : > { %v936_v3 = vmul.f32 %v1661_v60, %v903_v62  ;;  %v867_v4 = vadd.f32 %v3038_v57, %v866_v1  ;;  %2264 = vmatpush3.bf16.msra.mxu0 %v3072_v48  ;;  %v3087_v60 = vpack.c.bf16 %v1314_v58, %v1313_v56  ;;  %v1316_v62 = vld [vmem:[#allocation8 + $0x58] sm:$0xff]  ;;  %v1674_v54 = vld [vmem:[%s2875_s12 + $0x120] sm:$0xff] }
 0x32d   : > { %v906_v59 = vmax.f32 %v872_v0, 0.0  ;;  %2266 = vmatprep.subr.bf16.mxu0 %v3074_v50  ;;  %v3091_v63 = vpack.c.bf16 %v1316_v62, %v1315_v61 }
 0x32e   : > { %v905_v12 = vmax.f32 %v867_v4, 0.0  ;;  %v1961_v13 = vpop.f32.mrb[12].mxu1  ;;  %2009 = vmatprep.mubr.f32.mxu0 %v936_v3 }
 0x32f   : > { %v882_v14 = vadd.f32 %v1961_v13, %v3038_v57  ;;  %v876_v15 = vpop.f32.mrb[13].mxu1  ;;  %2010 = vmatmul.mubr.f32.gmra.mrb[24].mxu0 %v937_v7  ;;  %v939_v20 = vmul.f32 %v1664_v11, %v906_v59 }
 0x330   : > { %v938_v16 = vmul.f32 %v1663_v8, %v905_v12  ;;  %v877_v17 = vadd.f32 %v3038_v57, %v876_v15  ;;  %2268 = vmatpush3.bf16.msra.mxu0 %v3074_v50 }
 0x331   : > { %v908_v21 = vmax.f32 %v882_v14, 0.0 }
 0x332   : > { %v907_v24 = vmax.f32 %v877_v17, 0.0  ;;  %v1964_v27 = vpop.f32.mrb[14].mxu1  ;;  %2012 = vmatprep.mubr.f32.mxu0 %v938_v16 }
 0x333   : > { %v892_v28 = vadd.f32 %v1964_v27, %v3038_v57  ;;  %v886_v29 = vpop.f32.mrb[15].mxu1  ;;  %2013 = vmatmul.mubr.f32.gmra.mrb[26].mxu0 %v939_v20  ;;  %v941_v34 = vmul.f32 %v1666_v23, %v908_v21 }
 0x334   : > { %v940_v30 = vmul.f32 %v1665_v22, %v907_v24  ;;  %v887_v31 = vadd.f32 %v3038_v57, %v886_v29  ;;  %v1309_v57 = vld [vmem:[#allocation8 + $0x20] sm:$0xff] }
 0x335   : > { %v910_v35 = vmax.f32 %v892_v28, 0.0  ;;  %v3079_v52 = vpack.c.bf16 %v1310_v51, %v1309_v57 }
 0x336   : > { %v909_v38 = vmax.f32 %v887_v31, 0.0  ;;  %2015 = vmatprep.mubr.f32.mxu0 %v940_v30 }
 0x337   : > { %2016 = vmatmul.mubr.f32.gmra.mrb[28].mxu0 %v941_v34  ;;  %v943_v42 = vmul.f32 %v1668_v37, %v910_v35  ;;  %2270 = vmatprep.subr.bf16.mxu0 %v3079_v52 }
 0x338   : > { %v942_v41 = vmul.f32 %v1667_v36, %v909_v38  ;;  %2272 = vmatpush3.bf16.msra.mxu0 %v3079_v52 }
 0x339   : > { %2274 = vmatprep.subr.bf16.mxu0 %v3083_v55 }
 0x33a   : > { %2018 = vmatprep.mubr.f32.mxu0 %v942_v41 }
 0x33b   : > { %2019 = vmatmul.mubr.f32.gmra.mrb[30].mxu0 %v943_v42 }
 0x33c   : > { %2276 = vmatpush3.bf16.msra.mxu0 %v3083_v55 }
 0x33d   : > { %2278 = vmatprep.subr.bf16.mxu0 %v3087_v60 }
 0x340   : > { %2280 = vmatpush3.bf16.msra.mxu0 %v3087_v60 }
 0x341   : > { %2282 = vmatprep.subr.bf16.mxu0 %v3091_v63 }
 0x344   : > { %2284 = vmatpush3.bf16.msra.mxu0 %v3091_v63 }
 0x3f2   : > { %v1999_v0 = vpop.f32.mrb[16].mxu0 }
 0x3f3   : > { %v1027_v1 = vpop.f32.mrb[17].mxu0 }
 0x3f4   : > { %v2229_v3 = vpack.c.bf16 %v1999_v0, %v1027_v1 }
 0x3f6   : > { %v2002_v4 = vpop.f32.mrb[18].mxu0  ;;  %2230 = vmatprep.subr.bf16.mxu1 %v2229_v3 }
 0x3f7   : > { %v1037_v7 = vpop.f32.mrb[19].mxu0  ;;  %2232 = vmatpush3.bf16.msra.mxu1 %v2229_v3  ;;  %v1676_v3 = vld [vmem:[%s2875_s12 + $0x130] sm:$0xff] }
 0x3f8   : > { %v2233_v59 = vpack.c.bf16 %v2002_v4, %v1037_v7  ;;  %v1677_v4 = vld [vmem:[%s2875_s12 + $0x138] sm:$0xff] }
 0x3fa   : > { %v2005_v8 = vpop.f32.mrb[20].mxu0  ;;  %2234 = vmatprep.subr.bf16.mxu1 %v2233_v59 }
 0x3fb   : > { %v1047_v11 = vpop.f32.mrb[21].mxu0  ;;  %2236 = vmatpush3.bf16.msra.mxu1 %v2233_v59 }
 0x3fc   : > { %v2237_v12 = vpack.c.bf16 %v2005_v8, %v1047_v11 }
 0x3fe   : > { %v2008_v13 = vpop.f32.mrb[22].mxu0  ;;  %2238 = vmatprep.subr.bf16.mxu1 %v2237_v12 }
 0x3ff   : > { %v1057_v14 = vpop.f32.mrb[23].mxu0  ;;  %2240 = vmatpush3.bf16.msra.mxu1 %v2237_v12 }
 0x400   : > { %v2241_v15 = vpack.c.bf16 %v2008_v13, %v1057_v14 }
 0x402   : > { %v2011_v16 = vpop.f32.mrb[24].mxu0  ;;  %2242 = vmatprep.subr.bf16.mxu1 %v2241_v15 }
 0x403   : > { %v1067_v17 = vpop.f32.mrb[25].mxu0  ;;  %2244 = vmatpush3.bf16.msra.mxu1 %v2241_v15 }
 0x404   : > { %v2245_v20 = vpack.c.bf16 %v2011_v16, %v1067_v17  ;;  %v1678_v16 = vld [vmem:[%s2875_s12 + $0x140] sm:$0xff]  ;;  %v1679_v17 = vld [vmem:[%s2875_s12 + $0x148] sm:$0xff] }
 0x406   : > { %v2014_v21 = vpop.f32.mrb[26].mxu0  ;;  %2246 = vmatprep.subr.bf16.mxu1 %v2245_v20 }
 0x407   : > { %v1077_v22 = vpop.f32.mrb[27].mxu0  ;;  %2248 = vmatpush3.bf16.msra.mxu1 %v2245_v20 }
 0x408   : > { %v2249_v23 = vpack.c.bf16 %v2014_v21, %v1077_v22 }
 0x40a   : > { %v2017_v24 = vpop.f32.mrb[28].mxu0  ;;  %2250 = vmatprep.subr.bf16.mxu1 %v2249_v23 }
 0x40b   : > { %v1087_v27 = vpop.f32.mrb[29].mxu0  ;;  %2252 = vmatpush3.bf16.msra.mxu1 %v2249_v23 }
 0x40c   : > { %v2253_v28 = vpack.c.bf16 %v2017_v24, %v1087_v27 }
 0x40e   : > { %v2020_v29 = vpop.f32.mrb[30].mxu0  ;;  %2254 = vmatprep.subr.bf16.mxu1 %v2253_v28 }
 0x40f   : > { %v1097_v30 = vpop.f32.mrb[31].mxu0  ;;  %2256 = vmatpush3.bf16.msra.mxu1 %v2253_v28 }
 0x410   : > { %v2257_v31 = vpack.c.bf16 %v2020_v29, %v1097_v30  ;;  %v1680_v30 = vld [vmem:[%s2875_s12 + $0x150] sm:$0xff] }
 0x412   : > { %2258 = vmatprep.subr.bf16.mxu1 %v2257_v31 }
 0x413   : > { %2260 = vmatpush3.bf16.msra.mxu1 %v2257_v31  ;;  %v1681_v31 = vld [vmem:[%s2875_s12 + $0x158] sm:$0xff] }
 0x414   : > { %2293 = vmatprep.subr.bf16.mxu1 %v3072_v48 }
 0x416   : > { %2054 = vmatmul.mubr.f32.vlgmr.msra.gmra.mrb[16].mxu1 %v2904_v5  ;;  %v1318_v5 = vld [vmem:[#allocation8 + $0x68] sm:$0xff] }
 0x417   : > { %2056 = vmatprep.mubr.f32.mxu1 %v2898_v2  ;;  %2301 = vmatpush3.bf16.msra.mxu1 %v3072_v48  ;;  %v1317_v2 = vld [vmem:[#allocation8 + $0x60] sm:$0xff] }
 0x418   : > { %2294 = vmatprep.subr.bf16.mxu1 %v3074_v50 }
 0x41a   : > { %2057 = vmatmul.mubr.f32.gmra.mrb[18].mxu1 %v2906_v6  ;;  %v2285_v6 = vpack.c.bf16 %v1318_v5, %v1317_v2 }
 0x41b   : > { %2059 = vmatprep.mubr.f32.mxu1 %v2913_v9  ;;  %2302 = vmatpush3.bf16.msra.mxu1 %v3074_v50  ;;  %v1319_v9 = vld [vmem:[#allocation8 + $0x70] sm:$0xff] }
 0x41c   : > { %2295 = vmatprep.subr.bf16.mxu1 %v3079_v52  ;;  %2286 = vmatprep.subr.bf16.mxu0 %v2285_v6 }
 0x41d   : > { %2288 = vmatpush3.bf16.msra.mxu0 %v2285_v6 }
 0x41e   : > { %2060 = vmatmul.mubr.f32.gmra.mrb[20].mxu1 %v2915_v10  ;;  %v1320_v10 = vld [vmem:[#allocation8 + $0x78] sm:$0xff] }
 0x41f   : > { %2062 = vmatprep.mubr.f32.mxu1 %v2921_v18  ;;  %2303 = vmatpush3.bf16.msra.mxu1 %v3079_v52  ;;  %v2289_v18 = vpack.c.bf16 %v1320_v10, %v1319_v9 }
 0x420   : > { %2296 = vmatprep.subr.bf16.mxu1 %v3083_v55 }
 0x421   : > { %2290 = vmatprep.subr.bf16.mxu0 %v2289_v18 }
 0x422   : > { %2063 = vmatmul.mubr.f32.gmra.mrb[22].mxu1 %v2923_v19  ;;  %2292 = vmatpush3.bf16.msra.mxu0 %v2289_v18  ;;  %v3126_v19 = vld [vmem:[%s3233_s3 + $0x2] ss:$0 sm:$0xff] }
 0x423   : > { %2065 = vmatprep.mubr.f32.mxu1 %v2929_v25  ;;  %2304 = vmatpush3.bf16.msra.mxu1 %v3083_v55  ;;  %v1675_v55 = vld [vmem:[%s2875_s12 + $0x128] sm:$0xff] }
 0x424   : > { %2297 = vmatprep.subr.bf16.mxu1 %v3087_v60 }
 0x426   : > { %2066 = vmatmul.mubr.f32.gmra.mrb[24].mxu1 %v2931_v26 }
 0x427   : > { %2068 = vmatprep.mubr.f32.mxu1 %v2937_v32  ;;  %2305 = vmatpush3.bf16.msra.mxu1 %v3087_v60 }
 0x428   : > { %2298 = vmatprep.subr.bf16.mxu1 %v3091_v63 }
 0x42a   : > { %2069 = vmatmul.mubr.f32.gmra.mrb[26].mxu1 %v2939_v33 }
 0x42b   : > { %2071 = vmatprep.mubr.f32.mxu1 %v2945_v39  ;;  %2306 = vmatpush3.bf16.msra.mxu1 %v3091_v63 }
 0x42c   : > { %2299 = vmatprep.subr.bf16.mxu1 %v2285_v6 }
 0x42e   : > { %2072 = vmatmul.mubr.f32.gmra.mrb[28].mxu1 %v2947_v40  ;;  %v1670_v40 = vld [vmem:[%s2875_s12 + $0x100] sm:$0xff] }
 0x42f   : > { %2074 = vmatprep.mubr.f32.mxu1 %v2953_v46  ;;  %2307 = vmatpush3.bf16.msra.mxu1 %v2285_v6  ;;  %v1671_v46 = vld [vmem:[%s2875_s12 + $0x108] sm:$0xff] }
 0x430   : > { %2300 = vmatprep.subr.bf16.mxu1 %v2289_v18 }
 0x432   : > { %2075 = vmatmul.mubr.f32.gmra.mrb[30].mxu1 %v2955_v47 }
 0x433   : > { %2308 = vmatpush3.bf16.msra.mxu1 %v2289_v18 }
 0x4e9   : > { %v2055_v25 = vpop.f32.mrb[16].mxu1 }
 0x4ea   : > { %v1183_v26 = vadd.f32 %v2055_v25, %v3126_v19  ;;  %v1177_v32 = vpop.f32.mrb[17].mxu1 }
 0x4eb   : > { %v1178_v33 = vadd.f32 %v3126_v19, %v1177_v32  ;;  %v1682_v32 = vld [vmem:[%s2875_s12 + $0x160] sm:$0xff] }
 0x4ec   : > { %v1257_v39 = vmax.f32 %v1183_v26, 0.0 }
 0x4ed   : > { %v1256_v47 = vmax.f32 %v1178_v33, 0.0  ;;  %v2058_v34 = vpop.f32.mrb[18].mxu1  ;;  %v1683_v33 = vld [vmem:[%s2875_s12 + $0x168] sm:$0xff] }
 0x4ee   : > { %v1193_v35 = vadd.f32 %v2058_v34, %v3126_v19  ;;  %v1187_v36 = vpop.f32.mrb[19].mxu1  ;;  %v1290_v41 = vmul.f32 %v1671_v46, %v1257_v39 }
 0x4ef   : > { %v1289_v37 = vmul.f32 %v1670_v40, %v1256_v47  ;;  %v1188_v38 = vadd.f32 %v3126_v19, %v1187_v36 }
 0x4f0   : > { %v1259_v42 = vmax.f32 %v1193_v35, 0.0 }
 0x4f1   : > { %v1258_v45 = vmax.f32 %v1188_v38, 0.0  ;;  %v2061_v48 = vpop.f32.mrb[20].mxu1  ;;  %2109 = vmatprep.mubr.f32.mxu0 %v1289_v37  ;;  %v1684_v38 = vld [vmem:[%s2875_s12 + $0x170] sm:$0xff] }
 0x4f2   : > { %v1203_v49 = vadd.f32 %v2061_v48, %v3126_v19  ;;  %v1197_v50 = vpop.f32.mrb[21].mxu1  ;;  %2110 = vmatmul.mubr.f32.vlgmr.msra.gmra.mrb[32].mxu0 %v1290_v41  ;;  %v1292_v52 = vmul.f32 %v1673_v44, %v1259_v42  ;;  %v1685_v41 = vld [vmem:[%s2875_s12 + $0x178] sm:$0xff]  ;;  %v1321_v48 = vld [vmem:[#allocation9] sm:$0xff] }
 0x4f3   : > { %v1291_v57 = vmul.f32 %v1672_v43, %v1258_v45  ;;  %v1198_v51 = vadd.f32 %v3126_v19, %v1197_v50  ;;  %v1322_v45 = vld [vmem:[#allocation9 + $0x8] sm:$0xff] }
 0x4f4   : > { %v1261_v53 = vmax.f32 %v1203_v49, 0.0 }
 0x4f5   : > { %v1260_v56 = vmax.f32 %v1198_v51, 0.0  ;;  %v2064_v58 = vpop.f32.mrb[22].mxu1  ;;  %2112 = vmatprep.mubr.f32.mxu0 %v1291_v57 }
 0x4f6   : > { %v1213_v60 = vadd.f32 %v2064_v58, %v3126_v19  ;;  %v1207_v61 = vpop.f32.mrb[23].mxu1  ;;  %2113 = vmatmul.mubr.f32.gmra.mrb[34].mxu0 %v1292_v52  ;;  %v1294_v0 = vmul.f32 %v1675_v55, %v1261_v53  ;;  %v1324_v52 = vld [vmem:[#allocation9 + $0x18] sm:$0xff]  ;;  %v1326_v58 = vld [vmem:[#allocation9 + $0x28] sm:$0xff] }
 0x4f7   : > { %v1293_v62 = vmul.f32 %v1674_v54, %v1260_v56  ;;  %v1208_v63 = vadd.f32 %v3126_v19, %v1207_v61 }
 0x4f8   : > { %v1263_v1 = vmax.f32 %v1213_v60, 0.0  ;;  %v1325_v60 = vld [vmem:[#allocation9 + $0x20] sm:$0xff] }
 0x4f9   : > { %v1262_v7 = vmax.f32 %v1208_v63, 0.0  ;;  %v2067_v59 = vpop.f32.mrb[24].mxu1  ;;  %2115 = vmatprep.mubr.f32.mxu0 %v1293_v62 }
 0x4fa   : > { %v1223_v8 = vadd.f32 %v2067_v59, %v3126_v19  ;;  %v1217_v11 = vpop.f32.mrb[25].mxu1  ;;  %2116 = vmatmul.mubr.f32.gmra.mrb[36].mxu0 %v1294_v0  ;;  %v1296_v14 = vmul.f32 %v1677_v4, %v1263_v1  ;;  %v1328_v1 = vld [vmem:[#allocation9 + $0x38] sm:$0xff] }
 0x4fb   : > { %v1295_v12 = vmul.f32 %v1676_v3, %v1262_v7  ;;  %v1218_v13 = vadd.f32 %v3126_v19, %v1217_v11  ;;  %v1327_v3 = vld [vmem:[#allocation9 + $0x30] sm:$0xff]  ;;  %v1330_v11 = vld [vmem:[#allocation9 + $0x48] sm:$0xff] }
 0x4fc   : > { %v1265_v15 = vmax.f32 %v1223_v8, 0.0 }
 0x4fd   : > { %v1264_v20 = vmax.f32 %v1218_v13, 0.0  ;;  %v2070_v21 = vpop.f32.mrb[26].mxu1  ;;  %2118 = vmatprep.mubr.f32.mxu0 %v1295_v12  ;;  %v1329_v12 = vld [vmem:[#allocation9 + $0x40] sm:$0xff] }
 0x4fe   : > { %v1233_v22 = vadd.f32 %v2070_v21, %v3126_v19  ;;  %v1227_v23 = vpop.f32.mrb[27].mxu1  ;;  %2119 = vmatmul.mubr.f32.gmra.mrb[38].mxu0 %v1296_v14  ;;  %v1298_v28 = vmul.f32 %v1679_v17, %v1265_v15  ;;  %v1332_v17 = vld [vmem:[#allocation9 + $0x58] sm:$0xff] }
 0x4ff   : > { %v1297_v24 = vmul.f32 %v1678_v16, %v1264_v20  ;;  %v1228_v27 = vadd.f32 %v3126_v19, %v1227_v23  ;;  %v1331_v20 = vld [vmem:[#allocation9 + $0x50] sm:$0xff] }
 0x500   : > { %v1267_v29 = vmax.f32 %v1233_v22, 0.0 }
 0x501   : > { %v1266_v2 = vmax.f32 %v1228_v27, 0.0  ;;  %v2073_v5 = vpop.f32.mrb[28].mxu1  ;;  %2121 = vmatprep.mubr.f32.mxu1 %v1297_v24  ;;  %v1334_v27 = vld [vmem:[#allocation9 + $0x68] sm:$0xff] }
 0x502   : > { %v1243_v6 = vadd.f32 %v2073_v5, %v3126_v19  ;;  %v1237_v9 = vpop.f32.mrb[29].mxu1  ;;  %2122 = vmatmul.mubr.f32.vlgmr.msra.gmra.mrb[32].mxu1 %v1298_v28  ;;  %v1300_v25 = vmul.f32 %v1681_v31, %v1267_v29  ;;  %v1333_v28 = vld [vmem:[#allocation9 + $0x60] sm:$0xff]  ;;  %v1336_v5 = vld [vmem:[#allocation9 + $0x78] sm:$0xff] }
 0x503   : > { %v1299_v10 = vmul.f32 %v1680_v30, %v1266_v2  ;;  %v1238_v18 = vadd.f32 %v3126_v19, %v1237_v9 }
 0x504   : > { %v1269_v26 = vmax.f32 %v1243_v6, 0.0  ;;  %v1335_v6 = vld [vmem:[#allocation9 + $0x70] sm:$0xff] }
 0x505   : > { %v1268_v39 = vmax.f32 %v1238_v18, 0.0  ;;  %v2076_v40 = vpop.f32.mrb[30].mxu1  ;;  %2124 = vmatprep.mubr.f32.mxu1 %v1299_v10 }
 0x506   : > { %v1253_v46 = vadd.f32 %v2076_v40, %v3126_v19  ;;  %v1247_v47 = vpop.f32.mrb[31].mxu1  ;;  %2125 = vmatmul.mubr.f32.gmra.mrb[34].mxu1 %v1300_v25  ;;  %v1302_v36 = vmul.f32 %v1683_v33, %v1269_v26 }
 0x507   : > { %v1301_v34 = vmul.f32 %v1682_v32, %v1268_v39  ;;  %v1248_v35 = vadd.f32 %v3126_v19, %v1247_v47  ;;  %v1323_v19 = vld [vmem:[#allocation9 + $0x10] sm:$0xff] }
 0x508   : > { %v1271_v37 = vmax.f32 %v1253_v46, 0.0 }
 0x509   : > { %v1270_v42 = vmax.f32 %v1248_v35, 0.0  ;;  %2127 = vmatprep.mubr.f32.mxu1 %v1301_v34 }
 0x50a   : > { %2128 = vmatmul.mubr.f32.gmra.mrb[36].mxu1 %v1302_v36  ;;  %v1304_v44 = vmul.f32 %v1685_v41, %v1271_v37 }
 0x50b   : > { %v1303_v43 = vmul.f32 %v1684_v38, %v1270_v42 }
 0x50d   : > { %2130 = vmatprep.mubr.f32.mxu1 %v1303_v43 }
 0x50e   : > { %2131 = vmatmul.mubr.f32.gmra.mrb[38].mxu1 %v1304_v44 }
 0x5c5   : > { %v2111_v49 = vpop.f32.mrb[32].mxu0 }
 0x5c6   : > { %v1409_v50 = vadd.f32 %v2111_v49, %v1322_v45  ;;  %v1403_v57 = vpop.f32.mrb[33].mxu0 }
 0x5c7   : > { %v1404_v51 = vadd.f32 %v1403_v57, %v1321_v48 }
 0x5c8   : > { %1483 = vst [vmem:[%s3161_s4 + $0x8] sm:$0xff] %v1409_v50 }
 0x5c9   : > { %1482 = vst [vmem:[%s3161_s4] sm:$0xff] %v1404_v51  ;;  %v2114_v53 = vpop.f32.mrb[34].mxu0 }
 0x5ca   : > { %v1419_v54 = vadd.f32 %v2114_v53, %v1324_v52  ;;  %v1413_v55 = vpop.f32.mrb[35].mxu0 }
 0x5cb   : > { %v1414_v56 = vadd.f32 %v1413_v55, %v1323_v19 }
 0x5cc   : > { %1485 = vst [vmem:[%s3161_s4 + $0x18] sm:$0xff] %v1419_v54 }
 0x5cd   : > { %1484 = vst [vmem:[%s3161_s4 + $0x10] sm:$0xff] %v1414_v56  ;;  %v2117_v61 = vpop.f32.mrb[36].mxu0 }
 0x5ce   : > { %v1429_v62 = vadd.f32 %v2117_v61, %v1326_v58  ;;  %v1423_v63 = vpop.f32.mrb[37].mxu0 }
 0x5cf   : > { %v1424_v0 = vadd.f32 %v1423_v63, %v1325_v60 }
 0x5d0   : > { %1487 = vst [vmem:[%s3161_s4 + $0x28] sm:$0xff] %v1429_v62 }
 0x5d1   : > { %1486 = vst [vmem:[%s3161_s4 + $0x20] sm:$0xff] %v1424_v0  ;;  %v2120_v4 = vpop.f32.mrb[38].mxu0 }
 0x5d2   : > { %v1439_v7 = vadd.f32 %v2120_v4, %v1328_v1  ;;  %v1433_v59 = vpop.f32.mrb[39].mxu0 }
 0x5d3   : > { %v1434_v8 = vadd.f32 %v1433_v59, %v1327_v3 }
 0x5d4   : > { %1489 = vst [vmem:[%s3161_s4 + $0x38] sm:$0xff] %v1439_v7 }
 0x5d5   : > { %1488 = vst [vmem:[%s3161_s4 + $0x30] sm:$0xff] %v1434_v8  ;;  %v2123_v13 = vpop.f32.mrb[32].mxu1 }
 0x5d6   : > { %v1449_v14 = vadd.f32 %v2123_v13, %v1330_v11  ;;  %v1443_v15 = vpop.f32.mrb[33].mxu1 }
 0x5d7   : > { %v1444_v16 = vadd.f32 %v1443_v15, %v1329_v12 }
 0x5d8   : > { %1491 = vst [vmem:[%s3161_s4 + $0x48] sm:$0xff] %v1449_v14 }
 0x5d9   : > { %1490 = vst [vmem:[%s3161_s4 + $0x40] sm:$0xff] %v1444_v16  ;;  %v2126_v21 = vpop.f32.mrb[34].mxu1 }
 0x5da   : > { %v1459_v22 = vadd.f32 %v2126_v21, %v1332_v17  ;;  %v1453_v23 = vpop.f32.mrb[35].mxu1 }
 0x5db   : > { %v1454_v24 = vadd.f32 %v1453_v23, %v1331_v20 }
 0x5dc   : > { %1493 = vst [vmem:[%s3161_s4 + $0x58] sm:$0xff] %v1459_v22 }
 0x5dd   : > { %1492 = vst [vmem:[%s3161_s4 + $0x50] sm:$0xff] %v1454_v24  ;;  %v2129_v29 = vpop.f32.mrb[36].mxu1 }
 0x5de   : > { %v1469_v30 = vadd.f32 %v2129_v29, %v1334_v27  ;;  %v1463_v31 = vpop.f32.mrb[37].mxu1 }
 0x5df   : > { %v1464_v2 = vadd.f32 %v1463_v31, %v1333_v28 }
 0x5e0   : > { %1495 = vst [vmem:[%s3161_s4 + $0x68] sm:$0xff] %v1469_v30 }
 0x5e1   : > { %1494 = vst [vmem:[%s3161_s4 + $0x60] sm:$0xff] %v1464_v2  ;;  %v2132_v9 = vpop.f32.mrb[38].mxu1 }
 0x5e2   : > { %v1479_v10 = vadd.f32 %v2132_v9, %v1336_v5  ;;  %v1473_v18 = vpop.f32.mrb[39].mxu1 }
 0x5e3   : > { %v1474_v25 = vadd.f32 %v1473_v18, %v1335_v6 }
 0x5e4   : > { %1497 = vst [vmem:[%s3161_s4 + $0x78] sm:$0xff] %v1479_v10 }
 0x5e5   : > { %1496 = vst [vmem:[%s3161_s4 + $0x70] sm:$0xff] %v1474_v25 }
 0x5e6   : > { %2535 = shalt.err (!%p2532_p13)
}
 0x5e7   : > { %s2536_s23 = scalar_lea.hbm %s3182_s27, 2048  ;;  %s2540_s8 = scalar_lea.hbm %s3278_s10, 4096 }
 0x5e8   : > { %p2537_p0 = scmp.ne.s32.totalorder %s3182_s27, %s2536_s23  ;;  %p2541_p9 = scmp.lt.u32.totalorder %s3182_s27, %s3278_s10 }
 0x5e9   : > { %p2542_p10 = scmp.lt.u32.totalorder %s2540_s8, %s2536_s23  ;;  %p2544_p2 = scmp.lt.u32.totalorder %s2536_s23, %s3182_s27 }
 0x5ea   : > { %p2538_p7 = pnand %p2537_p0, %p3279_p3 }
 0x5eb   : > { %p2543_p1 = por %p2542_p10, %p2541_p9 }
 0x5ec   : > { %p2539_p8 = pneg %p2538_p7 }
 0x5ed   : > { %p2545_p5 = por %p2544_p2, %p2543_p1 }
 0x5ef   : > { %p2546_p6 = pnand %p2545_p5, %p2539_p8 }
 0x5f1   : > { %2549 = shalt.err (!%p2546_p6)
}
 0x5f2   : > { %s2619_s20 = smov 128   ;;  %s2620_s4 = smov 8  }
 0x5f3   : > { %2336 = dma.vmem_to_hbm [thread:$0]  (%p3279_p3), %s3184_s19, 2048, %s3182_s27, %s1499_s9, %s2619_s20, %s2619_s20, %s2620_s4  }
 0x5f4 PF: > { %s3280_s17 = sld [smem:[#allocation21_spill]]  ;;  %s3281_s26 = sld [smem:[#allocation25_spill]] }
 0x5fa   : > { %s1527_s12 = sand.u32 1, %s3280_s17   ;;  %p3282_p11 = scmp.ne.s32.totalorder %s3281_s26, 0 }
 0x5fb   : > { %s1528_s11 = scalar_lea.sflag [#allocation4], %s1527_s12 }
 0x5fc   : > { %p2352_p12 = pnand %p1638_p4, %p3282_p11 }
 0x5fe   : > { %2587 = dma.done.wait (!%p2352_p12), %s1528_s11, 2048  }
 0x5ff   : > { %2589 = vsyncadd (!%p2352_p12), %s1528_s11, 4294965248  ;;  %s3283_s30 = sld [smem:[#allocation22_spill]]  ;;  %s3284_s16 = sld [smem:[#allocation23_spill]] }
 0x600   : > { %s3285_s27 = smov %s2596_s28  ;;  %s3286_s28 = smov %s2600_s29 }
 0x605   : > { %p21_p13 = scmp.ge.s32.totalorder %s3283_s30, 4   ;;  %s3287_s29 = smov %s3284_s16 }
 0x607   :  { %23 = sbr.rel (!%p21_p13) target bundleno = 9 (0x9), region = 123 }
 0x60e   :  { %1533 = vsyncpa [#allocation3], 1 }
 0x60f   :  { %1535 = vsyncpa [#allocation3 + $0x1], 1 }
 0x610   :  { %1536 = vsyncpa [#allocation6], 1 }
 0x611   :  { %1537 = vsyncpa [#allocation10], 1 }
 0x612   :  { %1538 = vsyncpa [#allocation4], 1 }
 0x613   :  { %1540 = vsyncpa [#allocation4 + $0x1], 1 }

</bundles_post_ra>
